<compile_context>
chip_gen: v7x
topology: tpu7x:2x2x1
jax: 0.10.0
libtpu: 0.0.40
codegen_flags: <defaults>
</compile_context>

<pallas_src>
import functools

import jax
import jax.numpy as jnp
from jax import lax
from jax.experimental import pallas as pl
from jax.experimental.pallas import tpu as pltpu


def _disc_block_kernel(x_ref, w1_ref, b1_ref, w2_ref, b2_ref, o_ref, *,
                       h2, w2c, mxu_dtype):
    # x_ref : (1, 4, C_in, H2*W2)  polyphase input, p = 2*(row parity)+(col parity)
    # w1_ref: (9, C_in, 1)         depthwise 3x3 taps, tap t = 3*(dh+1)+(dw+1)
    # b1_ref: (C_in, 1)            depthwise conv bias
    # w2_ref: (C_out, C_in)        1x1 conv weights (mxu_dtype)
    # b2_ref: (C_out, 1)           1x1 conv bias
    # o_ref : (1, C_out, H2*W2)    pooled output, flat (H/2, W/2) row-major
    hw4 = h2 * w2c
    neg = jnp.float32(0.2)

    # Polyphase components, f32 for the VPU stage (v5e has no bf16 VPU).
    xall = x_ref[0].astype(jnp.float32)            # (4, C_in, hw4)
    xs = [xall[p] for p in range(4)]               # each (C_in, hw4)

    # In-kernel edge-validity masks from a single iota (no HBM mask stream).
    k = lax.broadcasted_iota(jnp.int32, (1, hw4), 1)
    col = k % w2c
    row_ok = {0: None, -1: k >= w2c, 1: k < (h2 - 1) * w2c}
    col_ok = {0: None, -1: col >= 1, 1: col <= w2c - 2}

    def edge_mask(d_r, d_c):
        m = None
        for cond in (row_ok[d_r], col_ok[d_c]):
            if cond is not None:
                m = cond if m is None else (m & cond)
        return None if m is None else m.astype(jnp.float32)

    # Shifted + masked source views, shared by all four output parity classes.
    # Key (vr, vc) with vr = pr + dh, vc = pc + dw; the source parity class is
    # (vr % 2, vc % 2) shifted by (vr // 2, vc // 2) super-rows / super-cols.
    prepared = {}
    for vr in (-1, 0, 1, 2):
        for vc in (-1, 0, 1, 2):
            src = xs[2 * (vr % 2) + (vc % 2)]
            off = (vr // 2) * w2c + (vc // 2)
            v = src if off == 0 else pltpu.roll(src, (-off) % hw4, 1)
            m = edge_mask(vr // 2, vc // 2)
            prepared[(vr, vc)] = v if m is None else v * m

    w2m = w2_ref[...]                              # (C_out, C_in), mxu dtype
    b1v = b1_ref[...]                              # (C_in, 1) f32
    b2v = b2_ref[...]                              # (C_out, 1) f32

    pooled = None
    for pr in (0, 1):
        for pc in (0, 1):
            # ---- depthwise 3x3 conv (padding=1, groups=C_in), this class ----
            acc = None
            for dh in (-1, 0, 1):
                for dw in (-1, 0, 1):
                    t = 3 * (dh + 1) + (dw + 1)
                    term = prepared[(pr + dh, pc + dw)] * w1_ref[t]
                    acc = term if acc is None else acc + term
            y = acc + b1v
            y = jnp.where(y >= 0, y, neg * y)                  # LeakyReLU(0.2)
            # ---- 1x1 conv: (C_out, C_in) @ (C_in, hw4) on the MXU ----
            z = jnp.dot(w2m, y.astype(mxu_dtype),
                        preferred_element_type=jnp.float32)
            z = z + b2v
            z = jnp.where(z >= 0, z, neg * z)                  # LeakyReLU(0.2)
            # ---- 2x2 avg pool == sum of the four parity-class outputs ----
            pooled = z if pooled is None else pooled + z

    o_ref[0] = (jnp.float32(0.25) * pooled).astype(o_ref.dtype)


def stylegan_discriminator_block(x, w1, b1, w2, b2, *, mxu_dtype=None):
    """x: (N,C_in,H,W); w1: (C_in,1,3,3); b1: (C_in,); w2: (C_out,C_in,1,1);
    b2: (C_out,).  Returns (N, C_out, H//2, W//2) in x.dtype.

    mxu_dtype=jnp.bfloat16 stores the x stream / w2 in bf16 and feeds bf16 MXU
    operands (f32 accumulate); the depthwise conv / activations stay f32 on the
    VPU (v5e-safe).  Default (None) is f32 end-to-end and bit-faithful to the
    PyTorch module.
    """
    N, C_in, H, W = x.shape
    C_out = w2.shape[0]
    assert H % 2 == 0 and W % 2 == 0 and H >= 4 and W >= 4
    H2, W2 = H // 2, W // 2
    HW4 = H2 * W2

    mxu_dt = jnp.dtype(mxu_dtype) if mxu_dtype is not None else jnp.dtype(jnp.float32)
    x_store_dt = mxu_dt if mxu_dt == jnp.dtype(jnp.bfloat16) else jnp.dtype(jnp.float32)

    # Polyphase (even/odd row x even/odd col), lane-dense flat layout.  Built
    # once in XLA; an upstream layer could emit this layout directly.
    x_par = (x.reshape(N, C_in, H2, 2, W2, 2)
               .transpose(0, 3, 5, 1, 2, 4)
               .reshape(N, 4, C_in, HW4)
               .astype(x_store_dt))
    w1_k = jnp.transpose(w1.reshape(C_in, 9)).reshape(9, C_in, 1).astype(jnp.float32)
    b1_k = b1.reshape(C_in, 1).astype(jnp.float32)
    w2_k = w2.reshape(C_out, C_in).astype(mxu_dt)
    b2_k = b2.reshape(C_out, 1).astype(jnp.float32)

    # Generation-aware VMEM budget: pipeline blocks + constants + live f32
    # temporaries, capped at 3/4 of this chip's VMEM (64 MiB v7x, 128 MiB v5e/v6e).
    sx = x_par.dtype.itemsize
    sw = w2_k.dtype.itemsize
    so = jnp.dtype(x.dtype).itemsize
    blocks = (2 * 4 * C_in * HW4 * sx                       # x block, double-buffered
              + 2 * C_out * HW4 * so                        # out block
              + 2 * ((9 * C_in + C_in + C_out) * 4 + C_out * C_in * sw))
    live = 4 * ((4 + 16 + 2) * C_in * HW4 + 3 * C_out * HW4 + 8 * HW4)
    try:
        cap = int(getattr(pltpu.get_tpu_info(), "vmem_capacity_bytes", 64 << 20))
    except Exception:
        cap = 64 << 20
    vmem_limit = int(min(max(2 * (blocks + live), 16 << 20), (3 * cap) // 4))

    kernel = functools.partial(_disc_block_kernel, h2=H2, w2c=W2, mxu_dtype=mxu_dt)

    def invoke(single_buffer_consts):
        def const_spec(shape):
            idx = lambda n: (0,) * len(shape)
            if single_buffer_consts:
                return pl.BlockSpec(shape, idx, pipeline_mode=pl.Buffered(1))
            return pl.BlockSpec(shape, idx)

        grid_spec = pltpu.PrefetchScalarGridSpec(
            num_scalar_prefetch=0,
            grid=(N,),
            in_specs=[
                pl.BlockSpec((1, 4, C_in, HW4), lambda n: (n, 0, 0, 0)),
                const_spec((9, C_in, 1)),
                const_spec((C_in, 1)),
                const_spec((C_out, C_in)),
                const_spec((C_out, 1)),
            ],
            out_specs=pl.BlockSpec((1, C_out, HW4), lambda n: (n, 0, 0)),
        )
        return pl.pallas_call(
            kernel,
            out_shape=jax.ShapeDtypeStruct((N, C_out, HW4), x.dtype),
            grid_spec=grid_spec,
            compiler_params=pltpu.CompilerParams(
                dimension_semantics=("parallel",),
                vmem_limit_bytes=vmem_limit),
        )(x_par, w1_k, b1_k, w2_k, b2_k)

    try:
        out_flat = invoke(True)
    except Exception:
        # Fallback for Pallas versions without BlockSpec pipeline_mode /
        # Buffered(1): default double-buffering (constants are tiny anyway).
        out_flat = invoke(False)

    return out_flat.reshape(N, C_out, H2, W2)


def reference(x, w1, b1, w2, b2):
    """Pure-JAX reference matching the PyTorch module."""
    C_in = x.shape[1]
    y = lax.conv_general_dilated(
        x, w1, window_strides=(1, 1), padding=((1, 1), (1, 1)),
        dimension_numbers=('NCHW', 'OIHW', 'NCHW'),
        feature_group_count=C_in)
    y = y + b1[None, :, None, None]
    y = jnp.where(y >= 0, y, 0.2 * y)
    y = lax.conv_general_dilated(
        y, w2, window_strides=(1, 1), padding='VALID',
        dimension_numbers=('NCHW', 'OIHW', 'NCHW'))
    y = y + b2[None, :, None, None]
    y = jnp.where(y >= 0, y, 0.2 * y)
    N, C_out, H, W = y.shape
    y = y.reshape(N, C_out, H // 2, 2, W // 2, 2).mean(axis=(3, 5))
    return y


if __name__ == "__main__":
    N, C_in, C_out, H, W = 2, 4, 8, 16, 16

    key = jax.random.PRNGKey(0)
    kx, kw1, kb1, kw2, kb2 = jax.random.split(key, 5)
    x = jax.random.normal(kx, (N, C_in, H, W), jnp.float32)
    w1 = jax.random.normal(kw1, (C_in, 1, 3, 3), jnp.float32) * 0.2
    b1 = jax.random.normal(kb1, (C_in,), jnp.float32) * 0.1
    w2 = jax.random.normal(kw2, (C_out, C_in, 1, 1), jnp.float32) * 0.2
    b2 = jax.random.normal(kb2, (C_out,), jnp.float32) * 0.1

    ref = jax.block_until_ready(reference(x, w1, b1, w2, b2))

    # f32 path: bit-faithful to the PyTorch module, strict tolerance.
    out = jax.block_until_ready(stylegan_discriminator_block(x, w1, b1, w2, b2))
    assert out.shape == (N, C_out, H // 2, W // 2), out.shape
    assert jnp.allclose(out, ref, atol=1e-4, rtol=1e-4), \
        float(jnp.max(jnp.abs(out - ref)))

    # bf16 storage / MXU-input path (v6e/v7x optimization), loose tolerance.
    out_bf16 = jax.block_until_ready(
        stylegan_discriminator_block(x, w1, b1, w2, b2, mxu_dtype=jnp.bfloat16))
    assert jnp.allclose(out_bf16.astype(jnp.float32), ref, atol=5e-2, rtol=5e-2), \
        float(jnp.max(jnp.abs(out_bf16.astype(jnp.float32) - ref)))

    print("KERNEL_OK")
</pallas_src>

<mosaic_0001>
module attributes {stable_mosaic.version = 11 : i64} {
  func.func @_disc_block_kernel(%arg0: i32, %arg1: memref<1x4x4x64xf32, #tpu.memory_space<vmem>>, %arg2: memref<9x4x1xf32, #tpu.memory_space<vmem>>, %arg3: memref<4x1xf32, #tpu.memory_space<vmem>>, %arg4: memref<8x4xf32, #tpu.memory_space<vmem>>, %arg5: memref<8x1xf32, #tpu.memory_space<vmem>>, %arg6: memref<1x8x64xf32, #tpu.memory_space<vmem>>) attributes {dimension_semantics = [#tpu.dimension_semantics<parallel>], iteration_bounds = array<i64: 2>, scalar_prefetch = 0 : i64, scratch_operands = 0 : i64, tpu.core_type = #tpu.core_type<tc>, window_params = [{transform_indices = @transform_0, window_bounds = array<i64: 1, 4, 4, 64>}, {pipeline_mode = #tpu.pipeline_mode<synchronous>, transform_indices = @transform_1, window_bounds = array<i64: 9, 4, 1>}, {pipeline_mode = #tpu.pipeline_mode<synchronous>, transform_indices = @transform_2, window_bounds = array<i64: 4, 1>}, {pipeline_mode = #tpu.pipeline_mode<synchronous>, transform_indices = @transform_3, window_bounds = array<i64: 8, 4>}, {pipeline_mode = #tpu.pipeline_mode<synchronous>, transform_indices = @transform_4, window_bounds = array<i64: 8, 1>}, {transform_indices = @transform_5, window_bounds = array<i64: 1, 8, 64>}]} {
    %c0 = arith.constant 0 : index
    %c0_0 = arith.constant 0 : index
    %c0_1 = arith.constant 0 : index
    %c0_2 = arith.constant 0 : index
    %0 = vector.load %arg1[%c0, %c0_0, %c0_1, %c0_2] : memref<1x4x4x64xf32, #tpu.memory_space<vmem>>, vector<1x4x4x64xf32>
    %1 = vector.shape_cast %0 : vector<1x4x4x64xf32> to vector<4x4x64xf32>
    %2 = vector.extract_strided_slice %1 {offsets = [0, 0, 0], sizes = [1, 4, 64], strides = [1, 1, 1]} : vector<4x4x64xf32> to vector<1x4x64xf32>
    %3 = vector.shape_cast %2 : vector<1x4x64xf32> to vector<4x64xf32>
    %4 = vector.extract_strided_slice %1 {offsets = [1, 0, 0], sizes = [1, 4, 64], strides = [1, 1, 1]} : vector<4x4x64xf32> to vector<1x4x64xf32>
    %5 = vector.shape_cast %4 : vector<1x4x64xf32> to vector<4x64xf32>
    %6 = vector.extract_strided_slice %1 {offsets = [2, 0, 0], sizes = [1, 4, 64], strides = [1, 1, 1]} : vector<4x4x64xf32> to vector<1x4x64xf32>
    %7 = vector.shape_cast %6 : vector<1x4x64xf32> to vector<4x64xf32>
    %8 = vector.extract_strided_slice %1 {offsets = [3, 0, 0], sizes = [1, 4, 64], strides = [1, 1, 1]} : vector<4x4x64xf32> to vector<1x4x64xf32>
    %9 = vector.shape_cast %8 : vector<1x4x64xf32> to vector<4x64xf32>
    %10 = tpu.iota {dimensions = array<i32: 1>} : vector<1x64xi32>
    %c8_i32 = arith.constant 8 : i32
    %c0_i32 = arith.constant 0 : i32
    %11 = arith.cmpi eq, %c8_i32, %c0_i32 : i32
    %c1_i32 = arith.constant 1 : i32
    %12 = arith.select %11, %c1_i32, %c8_i32 : i32
    %13 = vector.broadcast %12 : i32 to vector<1x64xi32>
    %14 = arith.remsi %10, %13 : vector<1x64xi32>
    %c0_i32_3 = arith.constant 0 : i32
    %15 = vector.broadcast %c0_i32_3 : i32 to vector<1x64xi32>
    %16 = arith.cmpi ne, %14, %15 : vector<1x64xi32>
    %c0_i32_4 = arith.constant 0 : i32
    %17 = vector.broadcast %c0_i32_4 : i32 to vector<1x64xi32>
    %18 = arith.cmpi slt, %14, %17 : vector<1x64xi32>
    %c0_i32_5 = arith.constant 0 : i32
    %19 = arith.cmpi slt, %12, %c0_i32_5 : i32
    %20 = vector.broadcast %19 : i1 to vector<1x64xi1>
    %21 = vector.broadcast %20 : vector<1x64xi1> to vector<1x64xi1>
    %22 = arith.xori %18, %21 : vector<1x64xi1>
    %23 = arith.andi %22, %16 : vector<1x64xi1>
    %24 = vector.broadcast %12 : i32 to vector<1x64xi32>
    %25 = arith.addi %14, %24 : vector<1x64xi32>
    %26 = arith.select %23, %25, %14 : vector<1x64xi1>, vector<1x64xi32>
    %c8_i32_6 = arith.constant 8 : i32
    %27 = vector.broadcast %c8_i32_6 : i32 to vector<1x64xi32>
    %28 = arith.cmpi sge, %10, %27 : vector<1x64xi32>
    %c56_i32 = arith.constant 56 : i32
    %29 = vector.broadcast %c56_i32 : i32 to vector<1x64xi32>
    %30 = arith.cmpi slt, %10, %29 : vector<1x64xi32>
    %c1_i32_7 = arith.constant 1 : i32
    %31 = vector.broadcast %c1_i32_7 : i32 to vector<1x64xi32>
    %32 = arith.cmpi sge, %26, %31 : vector<1x64xi32>
    %c6_i32 = arith.constant 6 : i32
    %33 = vector.broadcast %c6_i32 : i32 to vector<1x64xi32>
    %34 = arith.cmpi sle, %26, %33 : vector<1x64xi32>
    %c9_i32 = arith.constant 9 : i32
    %35 = tpu.dynamic_rotate %9 by %c9_i32 dim 1 : vector<4x64xf32>, i32 -> vector<4x64xf32>
    %36 = arith.andi %28, %32 : vector<1x64xi1>
    %37 = arith.extui %36 : vector<1x64xi1> to vector<1x64xi32>
    %38 = arith.sitofp %37 : vector<1x64xi32> to vector<1x64xf32>
    %39 = vector.broadcast %38 : vector<1x64xf32> to vector<4x64xf32>
    %40 = arith.mulf %35, %39 : vector<4x64xf32>
    %c8_i32_8 = arith.constant 8 : i32
    %41 = tpu.dynamic_rotate %7 by %c8_i32_8 dim 1 : vector<4x64xf32>, i32 -> vector<4x64xf32>
    %42 = arith.extui %28 : vector<1x64xi1> to vector<1x64xi32>
    %43 = arith.sitofp %42 : vector<1x64xi32> to vector<1x64xf32>
    %44 = vector.broadcast %43 : vector<1x64xf32> to vector<4x64xf32>
    %45 = arith.mulf %41, %44 : vector<4x64xf32>
    %c8_i32_9 = arith.constant 8 : i32
    %46 = tpu.dynamic_rotate %9 by %c8_i32_9 dim 1 : vector<4x64xf32>, i32 -> vector<4x64xf32>
    %47 = arith.extui %28 : vector<1x64xi1> to vector<1x64xi32>
    %48 = arith.sitofp %47 : vector<1x64xi32> to vector<1x64xf32>
    %49 = vector.broadcast %48 : vector<1x64xf32> to vector<4x64xf32>
    %50 = arith.mulf %46, %49 : vector<4x64xf32>
    %c7_i32 = arith.constant 7 : i32
    %51 = tpu.dynamic_rotate %7 by %c7_i32 dim 1 : vector<4x64xf32>, i32 -> vector<4x64xf32>
    %52 = arith.andi %28, %34 : vector<1x64xi1>
    %53 = arith.extui %52 : vector<1x64xi1> to vector<1x64xi32>
    %54 = arith.sitofp %53 : vector<1x64xi32> to vector<1x64xf32>
    %55 = vector.broadcast %54 : vector<1x64xf32> to vector<4x64xf32>
    %56 = arith.mulf %51, %55 : vector<4x64xf32>
    %c1_i32_10 = arith.constant 1 : i32
    %57 = tpu.dynamic_rotate %5 by %c1_i32_10 dim 1 : vector<4x64xf32>, i32 -> vector<4x64xf32>
    %58 = arith.extui %32 : vector<1x64xi1> to vector<1x64xi32>
    %59 = arith.sitofp %58 : vector<1x64xi32> to vector<1x64xf32>
    %60 = vector.broadcast %59 : vector<1x64xf32> to vector<4x64xf32>
    %61 = arith.mulf %57, %60 : vector<4x64xf32>
    %c63_i32 = arith.constant 63 : i32
    %62 = tpu.dynamic_rotate %3 by %c63_i32 dim 1 : vector<4x64xf32>, i32 -> vector<4x64xf32>
    %63 = arith.extui %34 : vector<1x64xi1> to vector<1x64xi32>
    %64 = arith.sitofp %63 : vector<1x64xi32> to vector<1x64xf32>
    %65 = vector.broadcast %64 : vector<1x64xf32> to vector<4x64xf32>
    %66 = arith.mulf %62, %65 : vector<4x64xf32>
    %c1_i32_11 = arith.constant 1 : i32
    %67 = tpu.dynamic_rotate %9 by %c1_i32_11 dim 1 : vector<4x64xf32>, i32 -> vector<4x64xf32>
    %68 = arith.extui %32 : vector<1x64xi1> to vector<1x64xi32>
    %69 = arith.sitofp %68 : vector<1x64xi32> to vector<1x64xf32>
    %70 = vector.broadcast %69 : vector<1x64xf32> to vector<4x64xf32>
    %71 = arith.mulf %67, %70 : vector<4x64xf32>
    %c63_i32_12 = arith.constant 63 : i32
    %72 = tpu.dynamic_rotate %7 by %c63_i32_12 dim 1 : vector<4x64xf32>, i32 -> vector<4x64xf32>
    %73 = arith.extui %34 : vector<1x64xi1> to vector<1x64xi32>
    %74 = arith.sitofp %73 : vector<1x64xi32> to vector<1x64xf32>
    %75 = vector.broadcast %74 : vector<1x64xf32> to vector<4x64xf32>
    %76 = arith.mulf %72, %75 : vector<4x64xf32>
    %c57_i32 = arith.constant 57 : i32
    %77 = tpu.dynamic_rotate %5 by %c57_i32 dim 1 : vector<4x64xf32>, i32 -> vector<4x64xf32>
    %78 = arith.andi %30, %32 : vector<1x64xi1>
    %79 = arith.extui %78 : vector<1x64xi1> to vector<1x64xi32>
    %80 = arith.sitofp %79 : vector<1x64xi32> to vector<1x64xf32>
    %81 = vector.broadcast %80 : vector<1x64xf32> to vector<4x64xf32>
    %82 = arith.mulf %77, %81 : vector<4x64xf32>
    %c56_i32_13 = arith.constant 56 : i32
    %83 = tpu.dynamic_rotate %3 by %c56_i32_13 dim 1 : vector<4x64xf32>, i32 -> vector<4x64xf32>
    %84 = arith.extui %30 : vector<1x64xi1> to vector<1x64xi32>
    %85 = arith.sitofp %84 : vector<1x64xi32> to vector<1x64xf32>
    %86 = vector.broadcast %85 : vector<1x64xf32> to vector<4x64xf32>
    %87 = arith.mulf %83, %86 : vector<4x64xf32>
    %c56_i32_14 = arith.constant 56 : i32
    %88 = tpu.dynamic_rotate %5 by %c56_i32_14 dim 1 : vector<4x64xf32>, i32 -> vector<4x64xf32>
    %89 = arith.extui %30 : vector<1x64xi1> to vector<1x64xi32>
    %90 = arith.sitofp %89 : vector<1x64xi32> to vector<1x64xf32>
    %91 = vector.broadcast %90 : vector<1x64xf32> to vector<4x64xf32>
    %92 = arith.mulf %88, %91 : vector<4x64xf32>
    %c55_i32 = arith.constant 55 : i32
    %93 = tpu.dynamic_rotate %3 by %c55_i32 dim 1 : vector<4x64xf32>, i32 -> vector<4x64xf32>
    %94 = arith.andi %30, %34 : vector<1x64xi1>
    %95 = arith.extui %94 : vector<1x64xi1> to vector<1x64xi32>
    %96 = arith.sitofp %95 : vector<1x64xi32> to vector<1x64xf32>
    %97 = vector.broadcast %96 : vector<1x64xf32> to vector<4x64xf32>
    %98 = arith.mulf %93, %97 : vector<4x64xf32>
    %c0_15 = arith.constant 0 : index
    %c0_16 = arith.constant 0 : index
    %99 = vector.load %arg4[%c0_15, %c0_16] : memref<8x4xf32, #tpu.memory_space<vmem>>, vector<8x4xf32>
    %c0_17 = arith.constant 0 : index
    %c0_18 = arith.constant 0 : index
    %100 = vector.load %arg3[%c0_17, %c0_18] : memref<4x1xf32, #tpu.memory_space<vmem>>, vector<4x1xf32>
    %c0_19 = arith.constant 0 : index
    %c0_20 = arith.constant 0 : index
    %101 = vector.load %arg5[%c0_19, %c0_20] : memref<8x1xf32, #tpu.memory_space<vmem>>, vector<8x1xf32>
    %c0_21 = arith.constant 0 : index
    %c0_22 = arith.constant 0 : index
    %c0_23 = arith.constant 0 : index
    %102 = vector.load %arg2[%c0_21, %c0_22, %c0_23] : memref<9x4x1xf32, #tpu.memory_space<vmem>>, vector<1x4x1xf32>
    %103 = vector.shape_cast %102 : vector<1x4x1xf32> to vector<4x1xf32>
    %104 = vector.broadcast %103 : vector<4x1xf32> to vector<4x64xf32>
    %105 = arith.mulf %40, %104 : vector<4x64xf32>
    %c1 = arith.constant 1 : index
    %c0_24 = arith.constant 0 : index
    %c0_25 = arith.constant 0 : index
    %106 = vector.load %arg2[%c1, %c0_24, %c0_25] : memref<9x4x1xf32, #tpu.memory_space<vmem>>, vector<1x4x1xf32>
    %107 = vector.shape_cast %106 : vector<1x4x1xf32> to vector<4x1xf32>
    %108 = vector.broadcast %107 : vector<4x1xf32> to vector<4x64xf32>
    %109 = arith.mulf %45, %108 : vector<4x64xf32>
    %110 = arith.addf %105, %109 : vector<4x64xf32>
    %c2 = arith.constant 2 : index
    %c0_26 = arith.constant 0 : index
    %c0_27 = arith.constant 0 : index
    %111 = vector.load %arg2[%c2, %c0_26, %c0_27] : memref<9x4x1xf32, #tpu.memory_space<vmem>>, vector<1x4x1xf32>
    %112 = vector.shape_cast %111 : vector<1x4x1xf32> to vector<4x1xf32>
    %113 = vector.broadcast %112 : vector<4x1xf32> to vector<4x64xf32>
    %114 = arith.mulf %50, %113 : vector<4x64xf32>
    %115 = arith.addf %110, %114 : vector<4x64xf32>
    %c3 = arith.constant 3 : index
    %c0_28 = arith.constant 0 : index
    %c0_29 = arith.constant 0 : index
    %116 = vector.load %arg2[%c3, %c0_28, %c0_29] : memref<9x4x1xf32, #tpu.memory_space<vmem>>, vector<1x4x1xf32>
    %117 = vector.shape_cast %116 : vector<1x4x1xf32> to vector<4x1xf32>
    %118 = vector.broadcast %117 : vector<4x1xf32> to vector<4x64xf32>
    %119 = arith.mulf %61, %118 : vector<4x64xf32>
    %120 = arith.addf %115, %119 : vector<4x64xf32>
    %c4 = arith.constant 4 : index
    %c0_30 = arith.constant 0 : index
    %c0_31 = arith.constant 0 : index
    %121 = vector.load %arg2[%c4, %c0_30, %c0_31] : memref<9x4x1xf32, #tpu.memory_space<vmem>>, vector<1x4x1xf32>
    %122 = vector.shape_cast %121 : vector<1x4x1xf32> to vector<4x1xf32>
    %123 = vector.broadcast %122 : vector<4x1xf32> to vector<4x64xf32>
    %124 = arith.mulf %3, %123 : vector<4x64xf32>
    %125 = arith.addf %120, %124 : vector<4x64xf32>
    %c5 = arith.constant 5 : index
    %c0_32 = arith.constant 0 : index
    %c0_33 = arith.constant 0 : index
    %126 = vector.load %arg2[%c5, %c0_32, %c0_33] : memref<9x4x1xf32, #tpu.memory_space<vmem>>, vector<1x4x1xf32>
    %127 = vector.shape_cast %126 : vector<1x4x1xf32> to vector<4x1xf32>
    %128 = vector.broadcast %127 : vector<4x1xf32> to vector<4x64xf32>
    %129 = arith.mulf %5, %128 : vector<4x64xf32>
    %130 = arith.addf %125, %129 : vector<4x64xf32>
    %c6 = arith.constant 6 : index
    %c0_34 = arith.constant 0 : index
    %c0_35 = arith.constant 0 : index
    %131 = vector.load %arg2[%c6, %c0_34, %c0_35] : memref<9x4x1xf32, #tpu.memory_space<vmem>>, vector<1x4x1xf32>
    %132 = vector.shape_cast %131 : vector<1x4x1xf32> to vector<4x1xf32>
    %133 = vector.broadcast %132 : vector<4x1xf32> to vector<4x64xf32>
    %134 = arith.mulf %71, %133 : vector<4x64xf32>
    %135 = arith.addf %130, %134 : vector<4x64xf32>
    %c7 = arith.constant 7 : index
    %c0_36 = arith.constant 0 : index
    %c0_37 = arith.constant 0 : index
    %136 = vector.load %arg2[%c7, %c0_36, %c0_37] : memref<9x4x1xf32, #tpu.memory_space<vmem>>, vector<1x4x1xf32>
    %137 = vector.shape_cast %136 : vector<1x4x1xf32> to vector<4x1xf32>
    %138 = vector.broadcast %137 : vector<4x1xf32> to vector<4x64xf32>
    %139 = arith.mulf %7, %138 : vector<4x64xf32>
    %140 = arith.addf %135, %139 : vector<4x64xf32>
    %c8 = arith.constant 8 : index
    %c0_38 = arith.constant 0 : index
    %c0_39 = arith.constant 0 : index
    %141 = vector.load %arg2[%c8, %c0_38, %c0_39] : memref<9x4x1xf32, #tpu.memory_space<vmem>>, vector<1x4x1xf32>
    %142 = vector.shape_cast %141 : vector<1x4x1xf32> to vector<4x1xf32>
    %143 = vector.broadcast %142 : vector<4x1xf32> to vector<4x64xf32>
    %144 = arith.mulf %9, %143 : vector<4x64xf32>
    %145 = arith.addf %140, %144 : vector<4x64xf32>
    %146 = vector.broadcast %100 : vector<4x1xf32> to vector<4x64xf32>
    %147 = arith.addf %145, %146 : vector<4x64xf32>
    %cst = arith.constant 0.000000e+00 : f32
    %148 = vector.broadcast %cst : f32 to vector<4x64xf32>
    %149 = arith.cmpf oge, %147, %148 : vector<4x64xf32>
    %cst_40 = arith.constant 2.000000e-01 : f32
    %150 = vector.broadcast %cst_40 : f32 to vector<4x64xf32>
    %151 = arith.mulf %150, %147 : vector<4x64xf32>
    %152 = arith.select %149, %147, %151 : vector<4x64xi1>, vector<4x64xf32>
    %cst_41 = arith.constant dense<0.000000e+00> : vector<8x64xf32>
    %153 = tpu.matmul %99, %152, %cst_41 {dimension_numbers = #tpu.dot_dimension_numbers<[1], [0], [0], [1], [0, 0, 1, 1], [], []>} : vector<8x4xf32>, vector<4x64xf32>, vector<8x64xf32> -> vector<8x64xf32>
    %154 = vector.broadcast %101 : vector<8x1xf32> to vector<8x64xf32>
    %155 = arith.addf %153, %154 : vector<8x64xf32>
    %cst_42 = arith.constant 0.000000e+00 : f32
    %156 = vector.broadcast %cst_42 : f32 to vector<8x64xf32>
    %157 = arith.cmpf oge, %155, %156 : vector<8x64xf32>
    %cst_43 = arith.constant 2.000000e-01 : f32
    %158 = vector.broadcast %cst_43 : f32 to vector<8x64xf32>
    %159 = arith.mulf %158, %155 : vector<8x64xf32>
    %160 = arith.select %157, %155, %159 : vector<8x64xi1>, vector<8x64xf32>
    %c0_44 = arith.constant 0 : index
    %c0_45 = arith.constant 0 : index
    %c0_46 = arith.constant 0 : index
    %161 = vector.load %arg2[%c0_44, %c0_45, %c0_46] : memref<9x4x1xf32, #tpu.memory_space<vmem>>, vector<1x4x1xf32>
    %162 = vector.shape_cast %161 : vector<1x4x1xf32> to vector<4x1xf32>
    %163 = vector.broadcast %162 : vector<4x1xf32> to vector<4x64xf32>
    %164 = arith.mulf %45, %163 : vector<4x64xf32>
    %c1_47 = arith.constant 1 : index
    %c0_48 = arith.constant 0 : index
    %c0_49 = arith.constant 0 : index
    %165 = vector.load %arg2[%c1_47, %c0_48, %c0_49] : memref<9x4x1xf32, #tpu.memory_space<vmem>>, vector<1x4x1xf32>
    %166 = vector.shape_cast %165 : vector<1x4x1xf32> to vector<4x1xf32>
    %167 = vector.broadcast %166 : vector<4x1xf32> to vector<4x64xf32>
    %168 = arith.mulf %50, %167 : vector<4x64xf32>
    %169 = arith.addf %164, %168 : vector<4x64xf32>
    %c2_50 = arith.constant 2 : index
    %c0_51 = arith.constant 0 : index
    %c0_52 = arith.constant 0 : index
    %170 = vector.load %arg2[%c2_50, %c0_51, %c0_52] : memref<9x4x1xf32, #tpu.memory_space<vmem>>, vector<1x4x1xf32>
    %171 = vector.shape_cast %170 : vector<1x4x1xf32> to vector<4x1xf32>
    %172 = vector.broadcast %171 : vector<4x1xf32> to vector<4x64xf32>
    %173 = arith.mulf %56, %172 : vector<4x64xf32>
    %174 = arith.addf %169, %173 : vector<4x64xf32>
    %c3_53 = arith.constant 3 : index
    %c0_54 = arith.constant 0 : index
    %c0_55 = arith.constant 0 : index
    %175 = vector.load %arg2[%c3_53, %c0_54, %c0_55] : memref<9x4x1xf32, #tpu.memory_space<vmem>>, vector<1x4x1xf32>
    %176 = vector.shape_cast %175 : vector<1x4x1xf32> to vector<4x1xf32>
    %177 = vector.broadcast %176 : vector<4x1xf32> to vector<4x64xf32>
    %178 = arith.mulf %3, %177 : vector<4x64xf32>
    %179 = arith.addf %174, %178 : vector<4x64xf32>
    %c4_56 = arith.constant 4 : index
    %c0_57 = arith.constant 0 : index
    %c0_58 = arith.constant 0 : index
    %180 = vector.load %arg2[%c4_56, %c0_57, %c0_58] : memref<9x4x1xf32, #tpu.memory_space<vmem>>, vector<1x4x1xf32>
    %181 = vector.shape_cast %180 : vector<1x4x1xf32> to vector<4x1xf32>
    %182 = vector.broadcast %181 : vector<4x1xf32> to vector<4x64xf32>
    %183 = arith.mulf %5, %182 : vector<4x64xf32>
    %184 = arith.addf %179, %183 : vector<4x64xf32>
    %c5_59 = arith.constant 5 : index
    %c0_60 = arith.constant 0 : index
    %c0_61 = arith.constant 0 : index
    %185 = vector.load %arg2[%c5_59, %c0_60, %c0_61] : memref<9x4x1xf32, #tpu.memory_space<vmem>>, vector<1x4x1xf32>
    %186 = vector.shape_cast %185 : vector<1x4x1xf32> to vector<4x1xf32>
    %187 = vector.broadcast %186 : vector<4x1xf32> to vector<4x64xf32>
    %188 = arith.mulf %66, %187 : vector<4x64xf32>
    %189 = arith.addf %184, %188 : vector<4x64xf32>
    %c6_62 = arith.constant 6 : index
    %c0_63 = arith.constant 0 : index
    %c0_64 = arith.constant 0 : index
    %190 = vector.load %arg2[%c6_62, %c0_63, %c0_64] : memref<9x4x1xf32, #tpu.memory_space<vmem>>, vector<1x4x1xf32>
    %191 = vector.shape_cast %190 : vector<1x4x1xf32> to vector<4x1xf32>
    %192 = vector.broadcast %191 : vector<4x1xf32> to vector<4x64xf32>
    %193 = arith.mulf %7, %192 : vector<4x64xf32>
    %194 = arith.addf %189, %193 : vector<4x64xf32>
    %c7_65 = arith.constant 7 : index
    %c0_66 = arith.constant 0 : index
    %c0_67 = arith.constant 0 : index
    %195 = vector.load %arg2[%c7_65, %c0_66, %c0_67] : memref<9x4x1xf32, #tpu.memory_space<vmem>>, vector<1x4x1xf32>
    %196 = vector.shape_cast %195 : vector<1x4x1xf32> to vector<4x1xf32>
    %197 = vector.broadcast %196 : vector<4x1xf32> to vector<4x64xf32>
    %198 = arith.mulf %9, %197 : vector<4x64xf32>
    %199 = arith.addf %194, %198 : vector<4x64xf32>
    %c8_68 = arith.constant 8 : index
    %c0_69 = arith.constant 0 : index
    %c0_70 = arith.constant 0 : index
    %200 = vector.load %arg2[%c8_68, %c0_69, %c0_70] : memref<9x4x1xf32, #tpu.memory_space<vmem>>, vector<1x4x1xf32>
    %201 = vector.shape_cast %200 : vector<1x4x1xf32> to vector<4x1xf32>
    %202 = vector.broadcast %201 : vector<4x1xf32> to vector<4x64xf32>
    %203 = arith.mulf %76, %202 : vector<4x64xf32>
    %204 = arith.addf %199, %203 : vector<4x64xf32>
    %205 = vector.broadcast %100 : vector<4x1xf32> to vector<4x64xf32>
    %206 = arith.addf %204, %205 : vector<4x64xf32>
    %cst_71 = arith.constant 0.000000e+00 : f32
    %207 = vector.broadcast %cst_71 : f32 to vector<4x64xf32>
    %208 = arith.cmpf oge, %206, %207 : vector<4x64xf32>
    %cst_72 = arith.constant 2.000000e-01 : f32
    %209 = vector.broadcast %cst_72 : f32 to vector<4x64xf32>
    %210 = arith.mulf %209, %206 : vector<4x64xf32>
    %211 = arith.select %208, %206, %210 : vector<4x64xi1>, vector<4x64xf32>
    %cst_73 = arith.constant dense<0.000000e+00> : vector<8x64xf32>
    %212 = tpu.matmul %99, %211, %cst_73 {dimension_numbers = #tpu.dot_dimension_numbers<[1], [0], [0], [1], [0, 0, 1, 1], [], []>} : vector<8x4xf32>, vector<4x64xf32>, vector<8x64xf32> -> vector<8x64xf32>
    %213 = vector.broadcast %101 : vector<8x1xf32> to vector<8x64xf32>
    %214 = arith.addf %212, %213 : vector<8x64xf32>
    %cst_74 = arith.constant 0.000000e+00 : f32
    %215 = vector.broadcast %cst_74 : f32 to vector<8x64xf32>
    %216 = arith.cmpf oge, %214, %215 : vector<8x64xf32>
    %cst_75 = arith.constant 2.000000e-01 : f32
    %217 = vector.broadcast %cst_75 : f32 to vector<8x64xf32>
    %218 = arith.mulf %217, %214 : vector<8x64xf32>
    %219 = arith.select %216, %214, %218 : vector<8x64xi1>, vector<8x64xf32>
    %220 = arith.addf %160, %219 : vector<8x64xf32>
    %c0_76 = arith.constant 0 : index
    %c0_77 = arith.constant 0 : index
    %c0_78 = arith.constant 0 : index
    %221 = vector.load %arg2[%c0_76, %c0_77, %c0_78] : memref<9x4x1xf32, #tpu.memory_space<vmem>>, vector<1x4x1xf32>
    %222 = vector.shape_cast %221 : vector<1x4x1xf32> to vector<4x1xf32>
    %223 = vector.broadcast %222 : vector<4x1xf32> to vector<4x64xf32>
    %224 = arith.mulf %61, %223 : vector<4x64xf32>
    %c1_79 = arith.constant 1 : index
    %c0_80 = arith.constant 0 : index
    %c0_81 = arith.constant 0 : index
    %225 = vector.load %arg2[%c1_79, %c0_80, %c0_81] : memref<9x4x1xf32, #tpu.memory_space<vmem>>, vector<1x4x1xf32>
    %226 = vector.shape_cast %225 : vector<1x4x1xf32> to vector<4x1xf32>
    %227 = vector.broadcast %226 : vector<4x1xf32> to vector<4x64xf32>
    %228 = arith.mulf %3, %227 : vector<4x64xf32>
    %229 = arith.addf %224, %228 : vector<4x64xf32>
    %c2_82 = arith.constant 2 : index
    %c0_83 = arith.constant 0 : index
    %c0_84 = arith.constant 0 : index
    %230 = vector.load %arg2[%c2_82, %c0_83, %c0_84] : memref<9x4x1xf32, #tpu.memory_space<vmem>>, vector<1x4x1xf32>
    %231 = vector.shape_cast %230 : vector<1x4x1xf32> to vector<4x1xf32>
    %232 = vector.broadcast %231 : vector<4x1xf32> to vector<4x64xf32>
    %233 = arith.mulf %5, %232 : vector<4x64xf32>
    %234 = arith.addf %229, %233 : vector<4x64xf32>
    %c3_85 = arith.constant 3 : index
    %c0_86 = arith.constant 0 : index
    %c0_87 = arith.constant 0 : index
    %235 = vector.load %arg2[%c3_85, %c0_86, %c0_87] : memref<9x4x1xf32, #tpu.memory_space<vmem>>, vector<1x4x1xf32>
    %236 = vector.shape_cast %235 : vector<1x4x1xf32> to vector<4x1xf32>
    %237 = vector.broadcast %236 : vector<4x1xf32> to vector<4x64xf32>
    %238 = arith.mulf %71, %237 : vector<4x64xf32>
    %239 = arith.addf %234, %238 : vector<4x64xf32>
    %c4_88 = arith.constant 4 : index
    %c0_89 = arith.constant 0 : index
    %c0_90 = arith.constant 0 : index
    %240 = vector.load %arg2[%c4_88, %c0_89, %c0_90] : memref<9x4x1xf32, #tpu.memory_space<vmem>>, vector<1x4x1xf32>
    %241 = vector.shape_cast %240 : vector<1x4x1xf32> to vector<4x1xf32>
    %242 = vector.broadcast %241 : vector<4x1xf32> to vector<4x64xf32>
    %243 = arith.mulf %7, %242 : vector<4x64xf32>
    %244 = arith.addf %239, %243 : vector<4x64xf32>
    %c5_91 = arith.constant 5 : index
    %c0_92 = arith.constant 0 : index
    %c0_93 = arith.constant 0 : index
    %245 = vector.load %arg2[%c5_91, %c0_92, %c0_93] : memref<9x4x1xf32, #tpu.memory_space<vmem>>, vector<1x4x1xf32>
    %246 = vector.shape_cast %245 : vector<1x4x1xf32> to vector<4x1xf32>
    %247 = vector.broadcast %246 : vector<4x1xf32> to vector<4x64xf32>
    %248 = arith.mulf %9, %247 : vector<4x64xf32>
    %249 = arith.addf %244, %248 : vector<4x64xf32>
    %c6_94 = arith.constant 6 : index
    %c0_95 = arith.constant 0 : index
    %c0_96 = arith.constant 0 : index
    %250 = vector.load %arg2[%c6_94, %c0_95, %c0_96] : memref<9x4x1xf32, #tpu.memory_space<vmem>>, vector<1x4x1xf32>
    %251 = vector.shape_cast %250 : vector<1x4x1xf32> to vector<4x1xf32>
    %252 = vector.broadcast %251 : vector<4x1xf32> to vector<4x64xf32>
    %253 = arith.mulf %82, %252 : vector<4x64xf32>
    %254 = arith.addf %249, %253 : vector<4x64xf32>
    %c7_97 = arith.constant 7 : index
    %c0_98 = arith.constant 0 : index
    %c0_99 = arith.constant 0 : index
    %255 = vector.load %arg2[%c7_97, %c0_98, %c0_99] : memref<9x4x1xf32, #tpu.memory_space<vmem>>, vector<1x4x1xf32>
    %256 = vector.shape_cast %255 : vector<1x4x1xf32> to vector<4x1xf32>
    %257 = vector.broadcast %256 : vector<4x1xf32> to vector<4x64xf32>
    %258 = arith.mulf %87, %257 : vector<4x64xf32>
    %259 = arith.addf %254, %258 : vector<4x64xf32>
    %c8_100 = arith.constant 8 : index
    %c0_101 = arith.constant 0 : index
    %c0_102 = arith.constant 0 : index
    %260 = vector.load %arg2[%c8_100, %c0_101, %c0_102] : memref<9x4x1xf32, #tpu.memory_space<vmem>>, vector<1x4x1xf32>
    %261 = vector.shape_cast %260 : vector<1x4x1xf32> to vector<4x1xf32>
    %262 = vector.broadcast %261 : vector<4x1xf32> to vector<4x64xf32>
    %263 = arith.mulf %92, %262 : vector<4x64xf32>
    %264 = arith.addf %259, %263 : vector<4x64xf32>
    %265 = vector.broadcast %100 : vector<4x1xf32> to vector<4x64xf32>
    %266 = arith.addf %264, %265 : vector<4x64xf32>
    %cst_103 = arith.constant 0.000000e+00 : f32
    %267 = vector.broadcast %cst_103 : f32 to vector<4x64xf32>
    %268 = arith.cmpf oge, %266, %267 : vector<4x64xf32>
    %cst_104 = arith.constant 2.000000e-01 : f32
    %269 = vector.broadcast %cst_104 : f32 to vector<4x64xf32>
    %270 = arith.mulf %269, %266 : vector<4x64xf32>
    %271 = arith.select %268, %266, %270 : vector<4x64xi1>, vector<4x64xf32>
    %cst_105 = arith.constant dense<0.000000e+00> : vector<8x64xf32>
    %272 = tpu.matmul %99, %271, %cst_105 {dimension_numbers = #tpu.dot_dimension_numbers<[1], [0], [0], [1], [0, 0, 1, 1], [], []>} : vector<8x4xf32>, vector<4x64xf32>, vector<8x64xf32> -> vector<8x64xf32>
    %273 = vector.broadcast %101 : vector<8x1xf32> to vector<8x64xf32>
    %274 = arith.addf %272, %273 : vector<8x64xf32>
    %cst_106 = arith.constant 0.000000e+00 : f32
    %275 = vector.broadcast %cst_106 : f32 to vector<8x64xf32>
    %276 = arith.cmpf oge, %274, %275 : vector<8x64xf32>
    %cst_107 = arith.constant 2.000000e-01 : f32
    %277 = vector.broadcast %cst_107 : f32 to vector<8x64xf32>
    %278 = arith.mulf %277, %274 : vector<8x64xf32>
    %279 = arith.select %276, %274, %278 : vector<8x64xi1>, vector<8x64xf32>
    %280 = arith.addf %220, %279 : vector<8x64xf32>
    %c0_108 = arith.constant 0 : index
    %c0_109 = arith.constant 0 : index
    %c0_110 = arith.constant 0 : index
    %281 = vector.load %arg2[%c0_108, %c0_109, %c0_110] : memref<9x4x1xf32, #tpu.memory_space<vmem>>, vector<1x4x1xf32>
    %282 = vector.shape_cast %281 : vector<1x4x1xf32> to vector<4x1xf32>
    %283 = vector.broadcast %282 : vector<4x1xf32> to vector<4x64xf32>
    %284 = arith.mulf %3, %283 : vector<4x64xf32>
    %c1_111 = arith.constant 1 : index
    %c0_112 = arith.constant 0 : index
    %c0_113 = arith.constant 0 : index
    %285 = vector.load %arg2[%c1_111, %c0_112, %c0_113] : memref<9x4x1xf32, #tpu.memory_space<vmem>>, vector<1x4x1xf32>
    %286 = vector.shape_cast %285 : vector<1x4x1xf32> to vector<4x1xf32>
    %287 = vector.broadcast %286 : vector<4x1xf32> to vector<4x64xf32>
    %288 = arith.mulf %5, %287 : vector<4x64xf32>
    %289 = arith.addf %284, %288 : vector<4x64xf32>
    %c2_114 = arith.constant 2 : index
    %c0_115 = arith.constant 0 : index
    %c0_116 = arith.constant 0 : index
    %290 = vector.load %arg2[%c2_114, %c0_115, %c0_116] : memref<9x4x1xf32, #tpu.memory_space<vmem>>, vector<1x4x1xf32>
    %291 = vector.shape_cast %290 : vector<1x4x1xf32> to vector<4x1xf32>
    %292 = vector.broadcast %291 : vector<4x1xf32> to vector<4x64xf32>
    %293 = arith.mulf %66, %292 : vector<4x64xf32>
    %294 = arith.addf %289, %293 : vector<4x64xf32>
    %c3_117 = arith.constant 3 : index
    %c0_118 = arith.constant 0 : index
    %c0_119 = arith.constant 0 : index
    %295 = vector.load %arg2[%c3_117, %c0_118, %c0_119] : memref<9x4x1xf32, #tpu.memory_space<vmem>>, vector<1x4x1xf32>
    %296 = vector.shape_cast %295 : vector<1x4x1xf32> to vector<4x1xf32>
    %297 = vector.broadcast %296 : vector<4x1xf32> to vector<4x64xf32>
    %298 = arith.mulf %7, %297 : vector<4x64xf32>
    %299 = arith.addf %294, %298 : vector<4x64xf32>
    %c4_120 = arith.constant 4 : index
    %c0_121 = arith.constant 0 : index
    %c0_122 = arith.constant 0 : index
    %300 = vector.load %arg2[%c4_120, %c0_121, %c0_122] : memref<9x4x1xf32, #tpu.memory_space<vmem>>, vector<1x4x1xf32>
    %301 = vector.shape_cast %300 : vector<1x4x1xf32> to vector<4x1xf32>
    %302 = vector.broadcast %301 : vector<4x1xf32> to vector<4x64xf32>
    %303 = arith.mulf %9, %302 : vector<4x64xf32>
    %304 = arith.addf %299, %303 : vector<4x64xf32>
    %c5_123 = arith.constant 5 : index
    %c0_124 = arith.constant 0 : index
    %c0_125 = arith.constant 0 : index
    %305 = vector.load %arg2[%c5_123, %c0_124, %c0_125] : memref<9x4x1xf32, #tpu.memory_space<vmem>>, vector<1x4x1xf32>
    %306 = vector.shape_cast %305 : vector<1x4x1xf32> to vector<4x1xf32>
    %307 = vector.broadcast %306 : vector<4x1xf32> to vector<4x64xf32>
    %308 = arith.mulf %76, %307 : vector<4x64xf32>
    %309 = arith.addf %304, %308 : vector<4x64xf32>
    %c6_126 = arith.constant 6 : index
    %c0_127 = arith.constant 0 : index
    %c0_128 = arith.constant 0 : index
    %310 = vector.load %arg2[%c6_126, %c0_127, %c0_128] : memref<9x4x1xf32, #tpu.memory_space<vmem>>, vector<1x4x1xf32>
    %311 = vector.shape_cast %310 : vector<1x4x1xf32> to vector<4x1xf32>
    %312 = vector.broadcast %311 : vector<4x1xf32> to vector<4x64xf32>
    %313 = arith.mulf %87, %312 : vector<4x64xf32>
    %314 = arith.addf %309, %313 : vector<4x64xf32>
    %c7_129 = arith.constant 7 : index
    %c0_130 = arith.constant 0 : index
    %c0_131 = arith.constant 0 : index
    %315 = vector.load %arg2[%c7_129, %c0_130, %c0_131] : memref<9x4x1xf32, #tpu.memory_space<vmem>>, vector<1x4x1xf32>
    %316 = vector.shape_cast %315 : vector<1x4x1xf32> to vector<4x1xf32>
    %317 = vector.broadcast %316 : vector<4x1xf32> to vector<4x64xf32>
    %318 = arith.mulf %92, %317 : vector<4x64xf32>
    %319 = arith.addf %314, %318 : vector<4x64xf32>
    %c8_132 = arith.constant 8 : index
    %c0_133 = arith.constant 0 : index
    %c0_134 = arith.constant 0 : index
    %320 = vector.load %arg2[%c8_132, %c0_133, %c0_134] : memref<9x4x1xf32, #tpu.memory_space<vmem>>, vector<1x4x1xf32>
    %321 = vector.shape_cast %320 : vector<1x4x1xf32> to vector<4x1xf32>
    %322 = vector.broadcast %321 : vector<4x1xf32> to vector<4x64xf32>
    %323 = arith.mulf %98, %322 : vector<4x64xf32>
    %324 = arith.addf %319, %323 : vector<4x64xf32>
    %325 = vector.broadcast %100 : vector<4x1xf32> to vector<4x64xf32>
    %326 = arith.addf %324, %325 : vector<4x64xf32>
    %cst_135 = arith.constant 0.000000e+00 : f32
    %327 = vector.broadcast %cst_135 : f32 to vector<4x64xf32>
    %328 = arith.cmpf oge, %326, %327 : vector<4x64xf32>
    %cst_136 = arith.constant 2.000000e-01 : f32
    %329 = vector.broadcast %cst_136 : f32 to vector<4x64xf32>
    %330 = arith.mulf %329, %326 : vector<4x64xf32>
    %331 = arith.select %328, %326, %330 : vector<4x64xi1>, vector<4x64xf32>
    %cst_137 = arith.constant dense<0.000000e+00> : vector<8x64xf32>
    %332 = tpu.matmul %99, %331, %cst_137 {dimension_numbers = #tpu.dot_dimension_numbers<[1], [0], [0], [1], [0, 0, 1, 1], [], []>} : vector<8x4xf32>, vector<4x64xf32>, vector<8x64xf32> -> vector<8x64xf32>
    %333 = vector.broadcast %101 : vector<8x1xf32> to vector<8x64xf32>
    %334 = arith.addf %332, %333 : vector<8x64xf32>
    %cst_138 = arith.constant 0.000000e+00 : f32
    %335 = vector.broadcast %cst_138 : f32 to vector<8x64xf32>
    %336 = arith.cmpf oge, %334, %335 : vector<8x64xf32>
    %cst_139 = arith.constant 2.000000e-01 : f32
    %337 = vector.broadcast %cst_139 : f32 to vector<8x64xf32>
    %338 = arith.mulf %337, %334 : vector<8x64xf32>
    %339 = arith.select %336, %334, %338 : vector<8x64xi1>, vector<8x64xf32>
    %340 = arith.addf %280, %339 : vector<8x64xf32>
    %cst_140 = arith.constant 2.500000e-01 : f32
    %341 = vector.broadcast %cst_140 : f32 to vector<8x64xf32>
    %342 = arith.mulf %341, %340 : vector<8x64xf32>
    %c0_141 = arith.constant 0 : index
    %c0_142 = arith.constant 0 : index
    %c0_143 = arith.constant 0 : index
    %343 = vector.load %arg6[%c0_141, %c0_142, %c0_143] : memref<1x8x64xf32, #tpu.memory_space<vmem>>, vector<1x8x64xf32>
    %344 = vector.shape_cast %343 : vector<1x8x64xf32> to vector<8x64xf32>
    %345 = vector.shape_cast %342 : vector<8x64xf32> to vector<1x8x64xf32>
    tpu.vector_store %arg6[%c0_141, %c0_142, %c0_143], %345 {strides = array<i32>} : memref<1x8x64xf32, #tpu.memory_space<vmem>>, vector<1x8x64xf32>,
    return
  }
  func.func @transform_0(%arg0: i32) -> (i32, i32, i32, i32) {
    %c0_i32 = arith.constant 0 : i32
    %c0_i32_0 = arith.constant 0 : i32
    %c0_i32_1 = arith.constant 0 : i32
    %c0_i32_2 = arith.constant 0 : i32
    return %arg0, %c0_i32, %c0_i32_0, %c0_i32_1 : i32, i32, i32, i32
  }
  func.func @transform_1(%arg0: i32) -> (i32, i32, i32) {
    %c0_i32 = arith.constant 0 : i32
    %c0_i32_0 = arith.constant 0 : i32
    %c0_i32_1 = arith.constant 0 : i32
    %c0_i32_2 = arith.constant 0 : i32
    return %c0_i32, %c0_i32_0, %c0_i32_1 : i32, i32, i32
  }
  func.func @transform_2(%arg0: i32) -> (i32, i32) {
    %c0_i32 = arith.constant 0 : i32
    %c0_i32_0 = arith.constant 0 : i32
    %c0_i32_1 = arith.constant 0 : i32
    return %c0_i32, %c0_i32_0 : i32, i32
  }
  func.func @transform_3(%arg0: i32) -> (i32, i32) {
    %c0_i32 = arith.constant 0 : i32
    %c0_i32_0 = arith.constant 0 : i32
    %c0_i32_1 = arith.constant 0 : i32
    return %c0_i32, %c0_i32_0 : i32, i32
  }
  func.func @transform_4(%arg0: i32) -> (i32, i32) {
    %c0_i32 = arith.constant 0 : i32
    %c0_i32_0 = arith.constant 0 : i32
    %c0_i32_1 = arith.constant 0 : i32
    return %c0_i32, %c0_i32_0 : i32, i32
  }
  func.func @transform_5(%arg0: i32) -> (i32, i32, i32) {
    %c0_i32 = arith.constant 0 : i32
    %c0_i32_0 = arith.constant 0 : i32
    %c0_i32_1 = arith.constant 0 : i32
    return %arg0, %c0_i32, %c0_i32_0 : i32, i32, i32
  }
}

module attributes {stable_mosaic.version = 11 : i64} {
  func.func @_disc_block_kernel(%arg0: i32, %arg1: memref<1x4x4x64xf32, #tpu.memory_space<vmem>>, %arg2: memref<9x4x1xf32, #tpu.memory_space<vmem>>, %arg3: memref<4x1xf32, #tpu.memory_space<vmem>>, %arg4: memref<8x4xf32, #tpu.memory_space<vmem>>, %arg5: memref<8x1xf32, #tpu.memory_space<vmem>>, %arg6: memref<1x8x64xf32, #tpu.memory_space<vmem>>) attributes {dimension_semantics = [#tpu.dimension_semantics<parallel>], iteration_bounds = array<i64: 2>, scalar_prefetch = 0 : i64, scratch_operands = 0 : i64, tpu.core_type = #tpu.core_type<tc>, window_params = [{transform_indices = @transform_0, window_bounds = array<i64: 1, 4, 4, 64>}, {pipeline_mode = #tpu.pipeline_mode<synchronous>, transform_indices = @transform_1, window_bounds = array<i64: 9, 4, 1>}, {pipeline_mode = #tpu.pipeline_mode<synchronous>, transform_indices = @transform_2, window_bounds = array<i64: 4, 1>}, {pipeline_mode = #tpu.pipeline_mode<synchronous>, transform_indices = @transform_3, window_bounds = array<i64: 8, 4>}, {pipeline_mode = #tpu.pipeline_mode<synchronous>, transform_indices = @transform_4, window_bounds = array<i64: 8, 1>}, {transform_indices = @transform_5, window_bounds = array<i64: 1, 8, 64>}]} {
    %c0 = arith.constant 0 : index
    %c0_0 = arith.constant 0 : index
    %c0_1 = arith.constant 0 : index
    %c0_2 = arith.constant 0 : index
    %0 = vector.load %arg1[%c0, %c0_0, %c0_1, %c0_2] : memref<1x4x4x64xf32, #tpu.memory_space<vmem>>, vector<1x4x4x64xf32>
    %1 = vector.shape_cast %0 : vector<1x4x4x64xf32> to vector<4x4x64xf32>
    %2 = vector.extract_strided_slice %1 {offsets = [0, 0, 0], sizes = [1, 4, 64], strides = [1, 1, 1]} : vector<4x4x64xf32> to vector<1x4x64xf32>
    %3 = vector.shape_cast %2 : vector<1x4x64xf32> to vector<4x64xf32>
    %4 = vector.extract_strided_slice %1 {offsets = [1, 0, 0], sizes = [1, 4, 64], strides = [1, 1, 1]} : vector<4x4x64xf32> to vector<1x4x64xf32>
    %5 = vector.shape_cast %4 : vector<1x4x64xf32> to vector<4x64xf32>
    %6 = vector.extract_strided_slice %1 {offsets = [2, 0, 0], sizes = [1, 4, 64], strides = [1, 1, 1]} : vector<4x4x64xf32> to vector<1x4x64xf32>
    %7 = vector.shape_cast %6 : vector<1x4x64xf32> to vector<4x64xf32>
    %8 = vector.extract_strided_slice %1 {offsets = [3, 0, 0], sizes = [1, 4, 64], strides = [1, 1, 1]} : vector<4x4x64xf32> to vector<1x4x64xf32>
    %9 = vector.shape_cast %8 : vector<1x4x64xf32> to vector<4x64xf32>
    %10 = tpu.iota {dimensions = array<i32: 1>} : vector<1x64xi32>
    %c8_i32 = arith.constant 8 : i32
    %c0_i32 = arith.constant 0 : i32
    %11 = arith.cmpi eq, %c8_i32, %c0_i32 : i32
    %c1_i32 = arith.constant 1 : i32
    %12 = arith.select %11, %c1_i32, %c8_i32 : i32
    %13 = vector.broadcast %12 : i32 to vector<1x64xi32>
    %14 = arith.remsi %10, %13 : vector<1x64xi32>
    %c0_i32_3 = arith.constant 0 : i32
    %15 = vector.broadcast %c0_i32_3 : i32 to vector<1x64xi32>
    %16 = arith.cmpi ne, %14, %15 : vector<1x64xi32>
    %c0_i32_4 = arith.constant 0 : i32
    %17 = vector.broadcast %c0_i32_4 : i32 to vector<1x64xi32>
    %18 = arith.cmpi slt, %14, %17 : vector<1x64xi32>
    %c0_i32_5 = arith.constant 0 : i32
    %19 = arith.cmpi slt, %12, %c0_i32_5 : i32
    %20 = vector.broadcast %19 : i1 to vector<1x64xi1>
    %21 = vector.broadcast %20 : vector<1x64xi1> to vector<1x64xi1>
    %22 = arith.xori %18, %21 : vector<1x64xi1>
    %23 = arith.andi %22, %16 : vector<1x64xi1>
    %24 = vector.broadcast %12 : i32 to vector<1x64xi32>
    %25 = arith.addi %14, %24 : vector<1x64xi32>
    %26 = arith.select %23, %25, %14 : vector<1x64xi1>, vector<1x64xi32>
    %c8_i32_6 = arith.constant 8 : i32
    %27 = vector.broadcast %c8_i32_6 : i32 to vector<1x64xi32>
    %28 = arith.cmpi sge, %10, %27 : vector<1x64xi32>
    %c56_i32 = arith.constant 56 : i32
    %29 = vector.broadcast %c56_i32 : i32 to vector<1x64xi32>
    %30 = arith.cmpi slt, %10, %29 : vector<1x64xi32>
    %c1_i32_7 = arith.constant 1 : i32
    %31 = vector.broadcast %c1_i32_7 : i32 to vector<1x64xi32>
    %32 = arith.cmpi sge, %26, %31 : vector<1x64xi32>
    %c6_i32 = arith.constant 6 : i32
    %33 = vector.broadcast %c6_i32 : i32 to vector<1x64xi32>
    %34 = arith.cmpi sle, %26, %33 : vector<1x64xi32>
    %c9_i32 = arith.constant 9 : i32
    %35 = tpu.dynamic_rotate %9 by %c9_i32 dim 1 : vector<4x64xf32>, i32 -> vector<4x64xf32>
    %36 = arith.andi %28, %32 : vector<1x64xi1>
    %37 = arith.extui %36 : vector<1x64xi1> to vector<1x64xi32>
    %38 = arith.sitofp %37 : vector<1x64xi32> to vector<1x64xf32>
    %39 = vector.broadcast %38 : vector<1x64xf32> to vector<4x64xf32>
    %40 = arith.mulf %35, %39 : vector<4x64xf32>
    %c8_i32_8 = arith.constant 8 : i32
    %41 = tpu.dynamic_rotate %7 by %c8_i32_8 dim 1 : vector<4x64xf32>, i32 -> vector<4x64xf32>
    %42 = arith.extui %28 : vector<1x64xi1> to vector<1x64xi32>
    %43 = arith.sitofp %42 : vector<1x64xi32> to vector<1x64xf32>
    %44 = vector.broadcast %43 : vector<1x64xf32> to vector<4x64xf32>
    %45 = arith.mulf %41, %44 : vector<4x64xf32>
    %c8_i32_9 = arith.constant 8 : i32
    %46 = tpu.dynamic_rotate %9 by %c8_i32_9 dim 1 : vector<4x64xf32>, i32 -> vector<4x64xf32>
    %47 = arith.extui %28 : vector<1x64xi1> to vector<1x64xi32>
    %48 = arith.sitofp %47 : vector<1x64xi32> to vector<1x64xf32>
    %49 = vector.broadcast %48 : vector<1x64xf32> to vector<4x64xf32>
    %50 = arith.mulf %46, %49 : vector<4x64xf32>
    %c7_i32 = arith.constant 7 : i32
    %51 = tpu.dynamic_rotate %7 by %c7_i32 dim 1 : vector<4x64xf32>, i32 -> vector<4x64xf32>
    %52 = arith.andi %28, %34 : vector<1x64xi1>
    %53 = arith.extui %52 : vector<1x64xi1> to vector<1x64xi32>
    %54 = arith.sitofp %53 : vector<1x64xi32> to vector<1x64xf32>
    %55 = vector.broadcast %54 : vector<1x64xf32> to vector<4x64xf32>
    %56 = arith.mulf %51, %55 : vector<4x64xf32>
    %c1_i32_10 = arith.constant 1 : i32
    %57 = tpu.dynamic_rotate %5 by %c1_i32_10 dim 1 : vector<4x64xf32>, i32 -> vector<4x64xf32>
    %58 = arith.extui %32 : vector<1x64xi1> to vector<1x64xi32>
    %59 = arith.sitofp %58 : vector<1x64xi32> to vector<1x64xf32>
    %60 = vector.broadcast %59 : vector<1x64xf32> to vector<4x64xf32>
    %61 = arith.mulf %57, %60 : vector<4x64xf32>
    %c63_i32 = arith.constant 63 : i32
    %62 = tpu.dynamic_rotate %3 by %c63_i32 dim 1 : vector<4x64xf32>, i32 -> vector<4x64xf32>
    %63 = arith.extui %34 : vector<1x64xi1> to vector<1x64xi32>
    %64 = arith.sitofp %63 : vector<1x64xi32> to vector<1x64xf32>
    %65 = vector.broadcast %64 : vector<1x64xf32> to vector<4x64xf32>
    %66 = arith.mulf %62, %65 : vector<4x64xf32>
    %c1_i32_11 = arith.constant 1 : i32
    %67 = tpu.dynamic_rotate %9 by %c1_i32_11 dim 1 : vector<4x64xf32>, i32 -> vector<4x64xf32>
    %68 = arith.extui %32 : vector<1x64xi1> to vector<1x64xi32>
    %69 = arith.sitofp %68 : vector<1x64xi32> to vector<1x64xf32>
    %70 = vector.broadcast %69 : vector<1x64xf32> to vector<4x64xf32>
    %71 = arith.mulf %67, %70 : vector<4x64xf32>
    %c63_i32_12 = arith.constant 63 : i32
    %72 = tpu.dynamic_rotate %7 by %c63_i32_12 dim 1 : vector<4x64xf32>, i32 -> vector<4x64xf32>
    %73 = arith.extui %34 : vector<1x64xi1> to vector<1x64xi32>
    %74 = arith.sitofp %73 : vector<1x64xi32> to vector<1x64xf32>
    %75 = vector.broadcast %74 : vector<1x64xf32> to vector<4x64xf32>
    %76 = arith.mulf %72, %75 : vector<4x64xf32>
    %c57_i32 = arith.constant 57 : i32
    %77 = tpu.dynamic_rotate %5 by %c57_i32 dim 1 : vector<4x64xf32>, i32 -> vector<4x64xf32>
    %78 = arith.andi %30, %32 : vector<1x64xi1>
    %79 = arith.extui %78 : vector<1x64xi1> to vector<1x64xi32>
    %80 = arith.sitofp %79 : vector<1x64xi32> to vector<1x64xf32>
    %81 = vector.broadcast %80 : vector<1x64xf32> to vector<4x64xf32>
    %82 = arith.mulf %77, %81 : vector<4x64xf32>
    %c56_i32_13 = arith.constant 56 : i32
    %83 = tpu.dynamic_rotate %3 by %c56_i32_13 dim 1 : vector<4x64xf32>, i32 -> vector<4x64xf32>
    %84 = arith.extui %30 : vector<1x64xi1> to vector<1x64xi32>
    %85 = arith.sitofp %84 : vector<1x64xi32> to vector<1x64xf32>
    %86 = vector.broadcast %85 : vector<1x64xf32> to vector<4x64xf32>
    %87 = arith.mulf %83, %86 : vector<4x64xf32>
    %c56_i32_14 = arith.constant 56 : i32
    %88 = tpu.dynamic_rotate %5 by %c56_i32_14 dim 1 : vector<4x64xf32>, i32 -> vector<4x64xf32>
    %89 = arith.extui %30 : vector<1x64xi1> to vector<1x64xi32>
    %90 = arith.sitofp %89 : vector<1x64xi32> to vector<1x64xf32>
    %91 = vector.broadcast %90 : vector<1x64xf32> to vector<4x64xf32>
    %92 = arith.mulf %88, %91 : vector<4x64xf32>
    %c55_i32 = arith.constant 55 : i32
    %93 = tpu.dynamic_rotate %3 by %c55_i32 dim 1 : vector<4x64xf32>, i32 -> vector<4x64xf32>
    %94 = arith.andi %30, %34 : vector<1x64xi1>
    %95 = arith.extui %94 : vector<1x64xi1> to vector<1x64xi32>
    %96 = arith.sitofp %95 : vector<1x64xi32> to vector<1x64xf32>
    %97 = vector.broadcast %96 : vector<1x64xf32> to vector<4x64xf32>
    %98 = arith.mulf %93, %97 : vector<4x64xf32>
    %c0_15 = arith.constant 0 : index
    %c0_16 = arith.constant 0 : index
    %99 = vector.load %arg4[%c0_15, %c0_16] : memref<8x4xf32, #tpu.memory_space<vmem>>, vector<8x4xf32>
    %c0_17 = arith.constant 0 : index
    %c0_18 = arith.constant 0 : index
    %100 = vector.load %arg3[%c0_17, %c0_18] : memref<4x1xf32, #tpu.memory_space<vmem>>, vector<4x1xf32>
    %c0_19 = arith.constant 0 : index
    %c0_20 = arith.constant 0 : index
    %101 = vector.load %arg5[%c0_19, %c0_20] : memref<8x1xf32, #tpu.memory_space<vmem>>, vector<8x1xf32>
    %c0_21 = arith.constant 0 : index
    %c0_22 = arith.constant 0 : index
    %c0_23 = arith.constant 0 : index
    %102 = vector.load %arg2[%c0_21, %c0_22, %c0_23] : memref<9x4x1xf32, #tpu.memory_space<vmem>>, vector<1x4x1xf32>
    %103 = vector.shape_cast %102 : vector<1x4x1xf32> to vector<4x1xf32>
    %104 = vector.broadcast %103 : vector<4x1xf32> to vector<4x64xf32>
    %105 = arith.mulf %40, %104 : vector<4x64xf32>
    %c1 = arith.constant 1 : index
    %c0_24 = arith.constant 0 : index
    %c0_25 = arith.constant 0 : index
    %106 = vector.load %arg2[%c1, %c0_24, %c0_25] : memref<9x4x1xf32, #tpu.memory_space<vmem>>, vector<1x4x1xf32>
    %107 = vector.shape_cast %106 : vector<1x4x1xf32> to vector<4x1xf32>
    %108 = vector.broadcast %107 : vector<4x1xf32> to vector<4x64xf32>
    %109 = arith.mulf %45, %108 : vector<4x64xf32>
    %110 = arith.addf %105, %109 : vector<4x64xf32>
    %c2 = arith.constant 2 : index
    %c0_26 = arith.constant 0 : index
    %c0_27 = arith.constant 0 : index
    %111 = vector.load %arg2[%c2, %c0_26, %c0_27] : memref<9x4x1xf32, #tpu.memory_space<vmem>>, vector<1x4x1xf32>
    %112 = vector.shape_cast %111 : vector<1x4x1xf32> to vector<4x1xf32>
    %113 = vector.broadcast %112 : vector<4x1xf32> to vector<4x64xf32>
    %114 = arith.mulf %50, %113 : vector<4x64xf32>
    %115 = arith.addf %110, %114 : vector<4x64xf32>
    %c3 = arith.constant 3 : index
    %c0_28 = arith.constant 0 : index
    %c0_29 = arith.constant 0 : index
    %116 = vector.load %arg2[%c3, %c0_28, %c0_29] : memref<9x4x1xf32, #tpu.memory_space<vmem>>, vector<1x4x1xf32>
    %117 = vector.shape_cast %116 : vector<1x4x1xf32> to vector<4x1xf32>
    %118 = vector.broadcast %117 : vector<4x1xf32> to vector<4x64xf32>
    %119 = arith.mulf %61, %118 : vector<4x64xf32>
    %120 = arith.addf %115, %119 : vector<4x64xf32>
    %c4 = arith.constant 4 : index
    %c0_30 = arith.constant 0 : index
    %c0_31 = arith.constant 0 : index
    %121 = vector.load %arg2[%c4, %c0_30, %c0_31] : memref<9x4x1xf32, #tpu.memory_space<vmem>>, vector<1x4x1xf32>
    %122 = vector.shape_cast %121 : vector<1x4x1xf32> to vector<4x1xf32>
    %123 = vector.broadcast %122 : vector<4x1xf32> to vector<4x64xf32>
    %124 = arith.mulf %3, %123 : vector<4x64xf32>
    %125 = arith.addf %120, %124 : vector<4x64xf32>
    %c5 = arith.constant 5 : index
    %c0_32 = arith.constant 0 : index
    %c0_33 = arith.constant 0 : index
    %126 = vector.load %arg2[%c5, %c0_32, %c0_33] : memref<9x4x1xf32, #tpu.memory_space<vmem>>, vector<1x4x1xf32>
    %127 = vector.shape_cast %126 : vector<1x4x1xf32> to vector<4x1xf32>
    %128 = vector.broadcast %127 : vector<4x1xf32> to vector<4x64xf32>
    %129 = arith.mulf %5, %128 : vector<4x64xf32>
    %130 = arith.addf %125, %129 : vector<4x64xf32>
    %c6 = arith.constant 6 : index
    %c0_34 = arith.constant 0 : index
    %c0_35 = arith.constant 0 : index
    %131 = vector.load %arg2[%c6, %c0_34, %c0_35] : memref<9x4x1xf32, #tpu.memory_space<vmem>>, vector<1x4x1xf32>
    %132 = vector.shape_cast %131 : vector<1x4x1xf32> to vector<4x1xf32>
    %133 = vector.broadcast %132 : vector<4x1xf32> to vector<4x64xf32>
    %134 = arith.mulf %71, %133 : vector<4x64xf32>
    %135 = arith.addf %130, %134 : vector<4x64xf32>
    %c7 = arith.constant 7 : index
    %c0_36 = arith.constant 0 : index
    %c0_37 = arith.constant 0 : index
    %136 = vector.load %arg2[%c7, %c0_36, %c0_37] : memref<9x4x1xf32, #tpu.memory_space<vmem>>, vector<1x4x1xf32>
    %137 = vector.shape_cast %136 : vector<1x4x1xf32> to vector<4x1xf32>
    %138 = vector.broadcast %137 : vector<4x1xf32> to vector<4x64xf32>
    %139 = arith.mulf %7, %138 : vector<4x64xf32>
    %140 = arith.addf %135, %139 : vector<4x64xf32>
    %c8 = arith.constant 8 : index
    %c0_38 = arith.constant 0 : index
    %c0_39 = arith.constant 0 : index
    %141 = vector.load %arg2[%c8, %c0_38, %c0_39] : memref<9x4x1xf32, #tpu.memory_space<vmem>>, vector<1x4x1xf32>
    %142 = vector.shape_cast %141 : vector<1x4x1xf32> to vector<4x1xf32>
    %143 = vector.broadcast %142 : vector<4x1xf32> to vector<4x64xf32>
    %144 = arith.mulf %9, %143 : vector<4x64xf32>
    %145 = arith.addf %140, %144 : vector<4x64xf32>
    %146 = vector.broadcast %100 : vector<4x1xf32> to vector<4x64xf32>
    %147 = arith.addf %145, %146 : vector<4x64xf32>
    %cst = arith.constant 0.000000e+00 : f32
    %148 = vector.broadcast %cst : f32 to vector<4x64xf32>
    %149 = arith.cmpf oge, %147, %148 : vector<4x64xf32>
    %cst_40 = arith.constant 2.000000e-01 : f32
    %150 = vector.broadcast %cst_40 : f32 to vector<4x64xf32>
    %151 = arith.mulf %150, %147 : vector<4x64xf32>
    %152 = arith.select %149, %147, %151 : vector<4x64xi1>, vector<4x64xf32>
    %cst_41 = arith.constant dense<0.000000e+00> : vector<8x64xf32>
    %153 = tpu.matmul %99, %152, %cst_41 {dimension_numbers = #tpu.dot_dimension_numbers<[1], [0], [0], [1], [0, 0, 1, 1], [], []>} : vector<8x4xf32>, vector<4x64xf32>, vector<8x64xf32> -> vector<8x64xf32>
    %154 = vector.broadcast %101 : vector<8x1xf32> to vector<8x64xf32>
    %155 = arith.addf %153, %154 : vector<8x64xf32>
    %cst_42 = arith.constant 0.000000e+00 : f32
    %156 = vector.broadcast %cst_42 : f32 to vector<8x64xf32>
    %157 = arith.cmpf oge, %155, %156 : vector<8x64xf32>
    %cst_43 = arith.constant 2.000000e-01 : f32
    %158 = vector.broadcast %cst_43 : f32 to vector<8x64xf32>
    %159 = arith.mulf %158, %155 : vector<8x64xf32>
    %160 = arith.select %157, %155, %159 : vector<8x64xi1>, vector<8x64xf32>
    %c0_44 = arith.constant 0 : index
    %c0_45 = arith.constant 0 : index
    %c0_46 = arith.constant 0 : index
    %161 = vector.load %arg2[%c0_44, %c0_45, %c0_46] : memref<9x4x1xf32, #tpu.memory_space<vmem>>, vector<1x4x1xf32>
    %162 = vector.shape_cast %161 : vector<1x4x1xf32> to vector<4x1xf32>
    %163 = vector.broadcast %162 : vector<4x1xf32> to vector<4x64xf32>
    %164 = arith.mulf %45, %163 : vector<4x64xf32>
    %c1_47 = arith.constant 1 : index
    %c0_48 = arith.constant 0 : index
    %c0_49 = arith.constant 0 : index
    %165 = vector.load %arg2[%c1_47, %c0_48, %c0_49] : memref<9x4x1xf32, #tpu.memory_space<vmem>>, vector<1x4x1xf32>
    %166 = vector.shape_cast %165 : vector<1x4x1xf32> to vector<4x1xf32>
    %167 = vector.broadcast %166 : vector<4x1xf32> to vector<4x64xf32>
    %168 = arith.mulf %50, %167 : vector<4x64xf32>
    %169 = arith.addf %164, %168 : vector<4x64xf32>
    %c2_50 = arith.constant 2 : index
    %c0_51 = arith.constant 0 : index
    %c0_52 = arith.constant 0 : index
    %170 = vector.load %arg2[%c2_50, %c0_51, %c0_52] : memref<9x4x1xf32, #tpu.memory_space<vmem>>, vector<1x4x1xf32>
    %171 = vector.shape_cast %170 : vector<1x4x1xf32> to vector<4x1xf32>
    %172 = vector.broadcast %171 : vector<4x1xf32> to vector<4x64xf32>
    %173 = arith.mulf %56, %172 : vector<4x64xf32>
    %174 = arith.addf %169, %173 : vector<4x64xf32>
    %c3_53 = arith.constant 3 : index
    %c0_54 = arith.constant 0 : index
    %c0_55 = arith.constant 0 : index
    %175 = vector.load %arg2[%c3_53, %c0_54, %c0_55] : memref<9x4x1xf32, #tpu.memory_space<vmem>>, vector<1x4x1xf32>
    %176 = vector.shape_cast %175 : vector<1x4x1xf32> to vector<4x1xf32>
    %177 = vector.broadcast %176 : vector<4x1xf32> to vector<4x64xf32>
    %178 = arith.mulf %3, %177 : vector<4x64xf32>
    %179 = arith.addf %174, %178 : vector<4x64xf32>
    %c4_56 = arith.constant 4 : index
    %c0_57 = arith.constant 0 : index
    %c0_58 = arith.constant 0 : index
    %180 = vector.load %arg2[%c4_56, %c0_57, %c0_58] : memref<9x4x1xf32, #tpu.memory_space<vmem>>, vector<1x4x1xf32>
    %181 = vector.shape_cast %180 : vector<1x4x1xf32> to vector<4x1xf32>
    %182 = vector.broadcast %181 : vector<4x1xf32> to vector<4x64xf32>
    %183 = arith.mulf %5, %182 : vector<4x64xf32>
    %184 = arith.addf %179, %183 : vector<4x64xf32>
    %c5_59 = arith.constant 5 : index
    %c0_60 = arith.constant 0 : index
    %c0_61 = arith.constant 0 : index
    %185 = vector.load %arg2[%c5_59, %c0_60, %c0_61] : memref<9x4x1xf32, #tpu.memory_space<vmem>>, vector<1x4x1xf32>
    %186 = vector.shape_cast %185 : vector<1x4x1xf32> to vector<4x1xf32>
    %187 = vector.broadcast %186 : vector<4x1xf32> to vector<4x64xf32>
    %188 = arith.mulf %66, %187 : vector<4x64xf32>
    %189 = arith.addf %184, %188 : vector<4x64xf32>
    %c6_62 = arith.constant 6 : index
    %c0_63 = arith.constant 0 : index
    %c0_64 = arith.constant 0 : index
    %190 = vector.load %arg2[%c6_62, %c0_63, %c0_64] : memref<9x4x1xf32, #tpu.memory_space<vmem>>, vector<1x4x1xf32>
    %191 = vector.shape_cast %190 : vector<1x4x1xf32> to vector<4x1xf32>
    %192 = vector.broadcast %191 : vector<4x1xf32> to vector<4x64xf32>
    %193 = arith.mulf %7, %192 : vector<4x64xf32>
    %194 = arith.addf %189, %193 : vector<4x64xf32>
    %c7_65 = arith.constant 7 : index
    %c0_66 = arith.constant 0 : index
    %c0_67 = arith.constant 0 : index
    %195 = vector.load %arg2[%c7_65, %c0_66, %c0_67] : memref<9x4x1xf32, #tpu.memory_space<vmem>>, vector<1x4x1xf32>
    %196 = vector.shape_cast %195 : vector<1x4x1xf32> to vector<4x1xf32>
    %197 = vector.broadcast %196 : vector<4x1xf32> to vector<4x64xf32>
    %198 = arith.mulf %9, %197 : vector<4x64xf32>
    %199 = arith.addf %194, %198 : vector<4x64xf32>
    %c8_68 = arith.constant 8 : index
    %c0_69 = arith.constant 0 : index
    %c0_70 = arith.constant 0 : index
    %200 = vector.load %arg2[%c8_68, %c0_69, %c0_70] : memref<9x4x1xf32, #tpu.memory_space<vmem>>, vector<1x4x1xf32>
    %201 = vector.shape_cast %200 : vector<1x4x1xf32> to vector<4x1xf32>
    %202 = vector.broadcast %201 : vector<4x1xf32> to vector<4x64xf32>
    %203 = arith.mulf %76, %202 : vector<4x64xf32>
    %204 = arith.addf %199, %203 : vector<4x64xf32>
    %205 = vector.broadcast %100 : vector<4x1xf32> to vector<4x64xf32>
    %206 = arith.addf %204, %205 : vector<4x64xf32>
    %cst_71 = arith.constant 0.000000e+00 : f32
    %207 = vector.broadcast %cst_71 : f32 to vector<4x64xf32>
    %208 = arith.cmpf oge, %206, %207 : vector<4x64xf32>
    %cst_72 = arith.constant 2.000000e-01 : f32
    %209 = vector.broadcast %cst_72 : f32 to vector<4x64xf32>
    %210 = arith.mulf %209, %206 : vector<4x64xf32>
    %211 = arith.select %208, %206, %210 : vector<4x64xi1>, vector<4x64xf32>
    %cst_73 = arith.constant dense<0.000000e+00> : vector<8x64xf32>
    %212 = tpu.matmul %99, %211, %cst_73 {dimension_numbers = #tpu.dot_dimension_numbers<[1], [0], [0], [1], [0, 0, 1, 1], [], []>} : vector<8x4xf32>, vector<4x64xf32>, vector<8x64xf32> -> vector<8x64xf32>
    %213 = vector.broadcast %101 : vector<8x1xf32> to vector<8x64xf32>
    %214 = arith.addf %212, %213 : vector<8x64xf32>
    %cst_74 = arith.constant 0.000000e+00 : f32
    %215 = vector.broadcast %cst_74 : f32 to vector<8x64xf32>
    %216 = arith.cmpf oge, %214, %215 : vector<8x64xf32>
    %cst_75 = arith.constant 2.000000e-01 : f32
    %217 = vector.broadcast %cst_75 : f32 to vector<8x64xf32>
    %218 = arith.mulf %217, %214 : vector<8x64xf32>
    %219 = arith.select %216, %214, %218 : vector<8x64xi1>, vector<8x64xf32>
    %220 = arith.addf %160, %219 : vector<8x64xf32>
    %c0_76 = arith.constant 0 : index
    %c0_77 = arith.constant 0 : index
    %c0_78 = arith.constant 0 : index
    %221 = vector.load %arg2[%c0_76, %c0_77, %c0_78] : memref<9x4x1xf32, #tpu.memory_space<vmem>>, vector<1x4x1xf32>
    %222 = vector.shape_cast %221 : vector<1x4x1xf32> to vector<4x1xf32>
    %223 = vector.broadcast %222 : vector<4x1xf32> to vector<4x64xf32>
    %224 = arith.mulf %61, %223 : vector<4x64xf32>
    %c1_79 = arith.constant 1 : index
    %c0_80 = arith.constant 0 : index
    %c0_81 = arith.constant 0 : index
    %225 = vector.load %arg2[%c1_79, %c0_80, %c0_81] : memref<9x4x1xf32, #tpu.memory_space<vmem>>, vector<1x4x1xf32>
    %226 = vector.shape_cast %225 : vector<1x4x1xf32> to vector<4x1xf32>
    %227 = vector.broadcast %226 : vector<4x1xf32> to vector<4x64xf32>
    %228 = arith.mulf %3, %227 : vector<4x64xf32>
    %229 = arith.addf %224, %228 : vector<4x64xf32>
    %c2_82 = arith.constant 2 : index
    %c0_83 = arith.constant 0 : index
    %c0_84 = arith.constant 0 : index
    %230 = vector.load %arg2[%c2_82, %c0_83, %c0_84] : memref<9x4x1xf32, #tpu.memory_space<vmem>>, vector<1x4x1xf32>
    %231 = vector.shape_cast %230 : vector<1x4x1xf32> to vector<4x1xf32>
    %232 = vector.broadcast %231 : vector<4x1xf32> to vector<4x64xf32>
    %233 = arith.mulf %5, %232 : vector<4x64xf32>
    %234 = arith.addf %229, %233 : vector<4x64xf32>
    %c3_85 = arith.constant 3 : index
    %c0_86 = arith.constant 0 : index
    %c0_87 = arith.constant 0 : index
    %235 = vector.load %arg2[%c3_85, %c0_86, %c0_87] : memref<9x4x1xf32, #tpu.memory_space<vmem>>, vector<1x4x1xf32>
    %236 = vector.shape_cast %235 : vector<1x4x1xf32> to vector<4x1xf32>
    %237 = vector.broadcast %236 : vector<4x1xf32> to vector<4x64xf32>
    %238 = arith.mulf %71, %237 : vector<4x64xf32>
    %239 = arith.addf %234, %238 : vector<4x64xf32>
    %c4_88 = arith.constant 4 : index
    %c0_89 = arith.constant 0 : index
    %c0_90 = arith.constant 0 : index
    %240 = vector.load %arg2[%c4_88, %c0_89, %c0_90] : memref<9x4x1xf32, #tpu.memory_space<vmem>>, vector<1x4x1xf32>
    %241 = vector.shape_cast %240 : vector<1x4x1xf32> to vector<4x1xf32>
    %242 = vector.broadcast %241 : vector<4x1xf32> to vector<4x64xf32>
    %243 = arith.mulf %7, %242 : vector<4x64xf32>
    %244 = arith.addf %239, %243 : vector<4x64xf32>
    %c5_91 = arith.constant 5 : index
    %c0_92 = arith.constant 0 : index
    %c0_93 = arith.constant 0 : index
    %245 = vector.load %arg2[%c5_91, %c0_92, %c0_93] : memref<9x4x1xf32, #tpu.memory_space<vmem>>, vector<1x4x1xf32>
    %246 = vector.shape_cast %245 : vector<1x4x1xf32> to vector<4x1xf32>
    %247 = vector.broadcast %246 : vector<4x1xf32> to vector<4x64xf32>
    %248 = arith.mulf %9, %247 : vector<4x64xf32>
    %249 = arith.addf %244, %248 : vector<4x64xf32>
    %c6_94 = arith.constant 6 : index
    %c0_95 = arith.constant 0 : index
    %c0_96 = arith.constant 0 : index
    %250 = vector.load %arg2[%c6_94, %c0_95, %c0_96] : memref<9x4x1xf32, #tpu.memory_space<vmem>>, vector<1x4x1xf32>
    %251 = vector.shape_cast %250 : vector<1x4x1xf32> to vector<4x1xf32>
    %252 = vector.broadcast %251 : vector<4x1xf32> to vector<4x64xf32>
    %253 = arith.mulf %82, %252 : vector<4x64xf32>
    %254 = arith.addf %249, %253 : vector<4x64xf32>
    %c7_97 = arith.constant 7 : index
    %c0_98 = arith.constant 0 : index
    %c0_99 = arith.constant 0 : index
    %255 = vector.load %arg2[%c7_97, %c0_98, %c0_99] : memref<9x4x1xf32, #tpu.memory_space<vmem>>, vector<1x4x1xf32>
    %256 = vector.shape_cast %255 : vector<1x4x1xf32> to vector<4x1xf32>
    %257 = vector.broadcast %256 : vector<4x1xf32> to vector<4x64xf32>
    %258 = arith.mulf %87, %257 : vector<4x64xf32>
    %259 = arith.addf %254, %258 : vector<4x64xf32>
    %c8_100 = arith.constant 8 : index
    %c0_101 = arith.constant 0 : index
    %c0_102 = arith.constant 0 : index
    %260 = vector.load %arg2[%c8_100, %c0_101, %c0_102] : memref<9x4x1xf32, #tpu.memory_space<vmem>>, vector<1x4x1xf32>
    %261 = vector.shape_cast %260 : vector<1x4x1xf32> to vector<4x1xf32>
    %262 = vector.broadcast %261 : vector<4x1xf32> to vector<4x64xf32>
    %263 = arith.mulf %92, %262 : vector<4x64xf32>
    %264 = arith.addf %259, %263 : vector<4x64xf32>
    %265 = vector.broadcast %100 : vector<4x1xf32> to vector<4x64xf32>
    %266 = arith.addf %264, %265 : vector<4x64xf32>
    %cst_103 = arith.constant 0.000000e+00 : f32
    %267 = vector.broadcast %cst_103 : f32 to vector<4x64xf32>
    %268 = arith.cmpf oge, %266, %267 : vector<4x64xf32>
    %cst_104 = arith.constant 2.000000e-01 : f32
    %269 = vector.broadcast %cst_104 : f32 to vector<4x64xf32>
    %270 = arith.mulf %269, %266 : vector<4x64xf32>
    %271 = arith.select %268, %266, %270 : vector<4x64xi1>, vector<4x64xf32>
    %cst_105 = arith.constant dense<0.000000e+00> : vector<8x64xf32>
    %272 = tpu.matmul %99, %271, %cst_105 {dimension_numbers = #tpu.dot_dimension_numbers<[1], [0], [0], [1], [0, 0, 1, 1], [], []>} : vector<8x4xf32>, vector<4x64xf32>, vector<8x64xf32> -> vector<8x64xf32>
    %273 = vector.broadcast %101 : vector<8x1xf32> to vector<8x64xf32>
    %274 = arith.addf %272, %273 : vector<8x64xf32>
    %cst_106 = arith.constant 0.000000e+00 : f32
    %275 = vector.broadcast %cst_106 : f32 to vector<8x64xf32>
    %276 = arith.cmpf oge, %274, %275 : vector<8x64xf32>
    %cst_107 = arith.constant 2.000000e-01 : f32
    %277 = vector.broadcast %cst_107 : f32 to vector<8x64xf32>
    %278 = arith.mulf %277, %274 : vector<8x64xf32>
    %279 = arith.select %276, %274, %278 : vector<8x64xi1>, vector<8x64xf32>
    %280 = arith.addf %220, %279 : vector<8x64xf32>
    %c0_108 = arith.constant 0 : index
    %c0_109 = arith.constant 0 : index
    %c0_110 = arith.constant 0 : index
    %281 = vector.load %arg2[%c0_108, %c0_109, %c0_110] : memref<9x4x1xf32, #tpu.memory_space<vmem>>, vector<1x4x1xf32>
    %282 = vector.shape_cast %281 : vector<1x4x1xf32> to vector<4x1xf32>
    %283 = vector.broadcast %282 : vector<4x1xf32> to vector<4x64xf32>
    %284 = arith.mulf %3, %283 : vector<4x64xf32>
    %c1_111 = arith.constant 1 : index
    %c0_112 = arith.constant 0 : index
    %c0_113 = arith.constant 0 : index
    %285 = vector.load %arg2[%c1_111, %c0_112, %c0_113] : memref<9x4x1xf32, #tpu.memory_space<vmem>>, vector<1x4x1xf32>
    %286 = vector.shape_cast %285 : vector<1x4x1xf32> to vector<4x1xf32>
    %287 = vector.broadcast %286 : vector<4x1xf32> to vector<4x64xf32>
    %288 = arith.mulf %5, %287 : vector<4x64xf32>
    %289 = arith.addf %284, %288 : vector<4x64xf32>
    %c2_114 = arith.constant 2 : index
    %c0_115 = arith.constant 0 : index
    %c0_116 = arith.constant 0 : index
    %290 = vector.load %arg2[%c2_114, %c0_115, %c0_116] : memref<9x4x1xf32, #tpu.memory_space<vmem>>, vector<1x4x1xf32>
    %291 = vector.shape_cast %290 : vector<1x4x1xf32> to vector<4x1xf32>
    %292 = vector.broadcast %291 : vector<4x1xf32> to vector<4x64xf32>
    %293 = arith.mulf %66, %292 : vector<4x64xf32>
    %294 = arith.addf %289, %293 : vector<4x64xf32>
    %c3_117 = arith.constant 3 : index
    %c0_118 = arith.constant 0 : index
    %c0_119 = arith.constant 0 : index
    %295 = vector.load %arg2[%c3_117, %c0_118, %c0_119] : memref<9x4x1xf32, #tpu.memory_space<vmem>>, vector<1x4x1xf32>
    %296 = vector.shape_cast %295 : vector<1x4x1xf32> to vector<4x1xf32>
    %297 = vector.broadcast %296 : vector<4x1xf32> to vector<4x64xf32>
    %298 = arith.mulf %7, %297 : vector<4x64xf32>
    %299 = arith.addf %294, %298 : vector<4x64xf32>
    %c4_120 = arith.constant 4 : index
    %c0_121 = arith.constant 0 : index
    %c0_122 = arith.constant 0 : index
    %300 = vector.load %arg2[%c4_120, %c0_121, %c0_122] : memref<9x4x1xf32, #tpu.memory_space<vmem>>, vector<1x4x1xf32>
    %301 = vector.shape_cast %300 : vector<1x4x1xf32> to vector<4x1xf32>
    %302 = vector.broadcast %301 : vector<4x1xf32> to vector<4x64xf32>
    %303 = arith.mulf %9, %302 : vector<4x64xf32>
    %304 = arith.addf %299, %303 : vector<4x64xf32>
    %c5_123 = arith.constant 5 : index
    %c0_124 = arith.constant 0 : index
    %c0_125 = arith.constant 0 : index
    %305 = vector.load %arg2[%c5_123, %c0_124, %c0_125] : memref<9x4x1xf32, #tpu.memory_space<vmem>>, vector<1x4x1xf32>
    %306 = vector.shape_cast %305 : vector<1x4x1xf32> to vector<4x1xf32>
    %307 = vector.broadcast %306 : vector<4x1xf32> to vector<4x64xf32>
    %308 = arith.mulf %76, %307 : vector<4x64xf32>
    %309 = arith.addf %304, %308 : vector<4x64xf32>
    %c6_126 = arith.constant 6 : index
    %c0_127 = arith.constant 0 : index
    %c0_128 = arith.constant 0 : index
    %310 = vector.load %arg2[%c6_126, %c0_127, %c0_128] : memref<9x4x1xf32, #tpu.memory_space<vmem>>, vector<1x4x1xf32>
    %311 = vector.shape_cast %310 : vector<1x4x1xf32> to vector<4x1xf32>
    %312 = vector.broadcast %311 : vector<4x1xf32> to vector<4x64xf32>
    %313 = arith.mulf %87, %312 : vector<4x64xf32>
    %314 = arith.addf %309, %313 : vector<4x64xf32>
    %c7_129 = arith.constant 7 : index
    %c0_130 = arith.constant 0 : index
    %c0_131 = arith.constant 0 : index
    %315 = vector.load %arg2[%c7_129, %c0_130, %c0_131] : memref<9x4x1xf32, #tpu.memory_space<vmem>>, vector<1x4x1xf32>
    %316 = vector.shape_cast %315 : vector<1x4x1xf32> to vector<4x1xf32>
    %317 = vector.broadcast %316 : vector<4x1xf32> to vector<4x64xf32>
    %318 = arith.mulf %92, %317 : vector<4x64xf32>
    %319 = arith.addf %314, %318 : vector<4x64xf32>
    %c8_132 = arith.constant 8 : index
    %c0_133 = arith.constant 0 : index
    %c0_134 = arith.constant 0 : index
    %320 = vector.load %arg2[%c8_132, %c0_133, %c0_134] : memref<9x4x1xf32, #tpu.memory_space<vmem>>, vector<1x4x1xf32>
    %321 = vector.shape_cast %320 : vector<1x4x1xf32> to vector<4x1xf32>
    %322 = vector.broadcast %321 : vector<4x1xf32> to vector<4x64xf32>
    %323 = arith.mulf %98, %322 : vector<4x64xf32>
    %324 = arith.addf %319, %323 : vector<4x64xf32>
    %325 = vector.broadcast %100 : vector<4x1xf32> to vector<4x64xf32>
    %326 = arith.addf %324, %325 : vector<4x64xf32>
    %cst_135 = arith.constant 0.000000e+00 : f32
    %327 = vector.broadcast %cst_135 : f32 to vector<4x64xf32>
    %328 = arith.cmpf oge, %326, %327 : vector<4x64xf32>
    %cst_136 = arith.constant 2.000000e-01 : f32
    %329 = vector.broadcast %cst_136 : f32 to vector<4x64xf32>
    %330 = arith.mulf %329, %326 : vector<4x64xf32>
    %331 = arith.select %328, %326, %330 : vector<4x64xi1>, vector<4x64xf32>
    %cst_137 = arith.constant dense<0.000000e+00> : vector<8x64xf32>
    %332 = tpu.matmul %99, %331, %cst_137 {dimension_numbers = #tpu.dot_dimension_numbers<[1], [0], [0], [1], [0, 0, 1, 1], [], []>} : vector<8x4xf32>, vector<4x64xf32>, vector<8x64xf32> -> vector<8x64xf32>
    %333 = vector.broadcast %101 : vector<8x1xf32> to vector<8x64xf32>
    %334 = arith.addf %332, %333 : vector<8x64xf32>
    %cst_138 = arith.constant 0.000000e+00 : f32
    %335 = vector.broadcast %cst_138 : f32 to vector<8x64xf32>
    %336 = arith.cmpf oge, %334, %335 : vector<8x64xf32>
    %cst_139 = arith.constant 2.000000e-01 : f32
    %337 = vector.broadcast %cst_139 : f32 to vector<8x64xf32>
    %338 = arith.mulf %337, %334 : vector<8x64xf32>
    %339 = arith.select %336, %334, %338 : vector<8x64xi1>, vector<8x64xf32>
    %340 = arith.addf %280, %339 : vector<8x64xf32>
    %cst_140 = arith.constant 2.500000e-01 : f32
    %341 = vector.broadcast %cst_140 : f32 to vector<8x64xf32>
    %342 = arith.mulf %341, %340 : vector<8x64xf32>
    %c0_141 = arith.constant 0 : index
    %c0_142 = arith.constant 0 : index
    %c0_143 = arith.constant 0 : index
    %343 = vector.load %arg6[%c0_141, %c0_142, %c0_143] : memref<1x8x64xf32, #tpu.memory_space<vmem>>, vector<1x8x64xf32>
    %344 = vector.shape_cast %343 : vector<1x8x64xf32> to vector<8x64xf32>
    %345 = vector.shape_cast %342 : vector<8x64xf32> to vector<1x8x64xf32>
    tpu.vector_store %arg6[%c0_141, %c0_142, %c0_143], %345 {strides = array<i32>} : memref<1x8x64xf32, #tpu.memory_space<vmem>>, vector<1x8x64xf32>,
    return
  }
  func.func @transform_0(%arg0: i32) -> (i32, i32, i32, i32) {
    %c0_i32 = arith.constant 0 : i32
    %c0_i32_0 = arith.constant 0 : i32
    %c0_i32_1 = arith.constant 0 : i32
    %c0_i32_2 = arith.constant 0 : i32
    return %arg0, %c0_i32, %c0_i32_0, %c0_i32_1 : i32, i32, i32, i32
  }
  func.func @transform_1(%arg0: i32) -> (i32, i32, i32) {
    %c0_i32 = arith.constant 0 : i32
    %c0_i32_0 = arith.constant 0 : i32
    %c0_i32_1 = arith.constant 0 : i32
    %c0_i32_2 = arith.constant 0 : i32
    return %c0_i32, %c0_i32_0, %c0_i32_1 : i32, i32, i32
  }
  func.func @transform_2(%arg0: i32) -> (i32, i32) {
    %c0_i32 = arith.constant 0 : i32
    %c0_i32_0 = arith.constant 0 : i32
    %c0_i32_1 = arith.constant 0 : i32
    return %c0_i32, %c0_i32_0 : i32, i32
  }
  func.func @transform_3(%arg0: i32) -> (i32, i32) {
    %c0_i32 = arith.constant 0 : i32
    %c0_i32_0 = arith.constant 0 : i32
    %c0_i32_1 = arith.constant 0 : i32
    return %c0_i32, %c0_i32_0 : i32, i32
  }
  func.func @transform_4(%arg0: i32) -> (i32, i32) {
    %c0_i32 = arith.constant 0 : i32
    %c0_i32_0 = arith.constant 0 : i32
    %c0_i32_1 = arith.constant 0 : i32
    return %c0_i32, %c0_i32_0 : i32, i32
  }
  func.func @transform_5(%arg0: i32) -> (i32, i32, i32) {
    %c0_i32 = arith.constant 0 : i32
    %c0_i32_0 = arith.constant 0 : i32
    %c0_i32_1 = arith.constant 0 : i32
    return %arg0, %c0_i32, %c0_i32_0 : i32, i32, i32
  }
}

</mosaic_0001>

<bundles_post_ra>
// kernel: tpu_custom_call.1
= control target key start
LH: loop header
LB: loop body
LE: loop exit
PB: predicated region body
PF: predicated region fallthrough
CT: control target
= control target key end

     0   :  { %10 = vsyncpa [#allocation3], 0  ;;  %s1590_s0 = inlined_call_operand.vmem [shape: f32[2,4,4,64], index: 0, kind: input, shape index: {}]   ;;  %s1591_s1 = inlined_call_operand.vmem [shape: f32[9,4,1], index: 1, kind: input, shape index: {}]   ;;  %s1592_s2 = inlined_call_operand.vmem [shape: f32[4,1], index: 2, kind: input, shape index: {}]   ;;  %s1593_s3 = inlined_call_operand.vmem [shape: f32[8,4], index: 3, kind: input, shape index: {}]   ;;  %s1594_s4 = inlined_call_operand.vmem [shape: f32[8,1], index: 4, kind: input, shape index: {}]   ;;  %s1595_s5 = inlined_call_operand.hbm [shape: f32[2,8,64], index: 5, kind: output, shape index: {}]  }
   0x1   :  { %12 = vsyncpa [#allocation3 + $0x1], 0  ;;  %s1231_s18 = smov 0   ;;  %s1233_s19 = smov 0  }
   0x2   :  { %s1235_s20 = smov 0   ;;  %s1237_s21 = smov 0  }
   0x3 LB: > { %s1252_s22 = sadd.s32 4294967295, %s1180_s21   ;;  %s995_s23 = sadd.s32 4294967294, %s1180_s21   ;;  %s1180_s21 = sphi %s1237_s21, %s1607_s21   ;;  %s1176_s20 = sphi %s1235_s20, %s1606_s20   ;;  %s1172_s19 = sphi %s1233_s19, %s1605_s19   ;;  %s1168_s18 = sphi %s1231_s18, %s1604_s18  }
   0x4   : > { %s1256_s24 = sadd.s32 1, %s1180_s21   ;;  %s135_s25 = sadd.s32 1, %s1176_s20 }
   0x5   : > { %s132_s26 = ssub.s32 %s1180_s21, %s1256_s24  ;;  %p145_p0 = scmp.ne.s32.totalorder %s1176_s20, %s1172_s19 }
   0x6   : > { %p133_p1 = scmp.eq.s32.totalorder %s132_s26, 0  ;;  %p146_p2 = scmp.eq.s32.totalorder %s1252_s22, 1 }
   0x7   : > { %p151_p3 = scmp.ne.s32.totalorder %s1172_s19, %s1168_s18  ;;  %p152_p4 = scmp.eq.s32.totalorder %s995_s23, 1 }
   0x8   : > { %s1267_s27 = scalar_select %p133_p1, %s1176_s20, %s135_s25  }
   0x9   : > { %p1269_p5 = por %p146_p2, %p145_p0  ;;  %p1273_p6 = por %p152_p4, %p151_p3 }
   0xa   : > { %p998_p7 = scmp.ge.s32.totalorder %s1180_s21, 1  ;;  %p190_p8 = scmp.lt.s32.totalorder %s1180_s21, 3 }
   0xc   : > { %p191_p9 = pnand %p998_p7, %p190_p8 }
   0xd   : > { %p218_p10 = scmp.lt.s32.totalorder (!%p191_p9), %s1252_s22, 1  ;;  %v1182_v0 = vmov (!%p191_p9), 0   ;;  %v1183_v1 = vmov (!%p191_p9), 0.0   ;;  %v227_v2 = vlaneseq (!%p191_p9)  ;;  %s1184_s10 = smov (!%p191_p9), 64   ;;  %v1011_v9 = vld [vmem:[%s1591_s1 + $0x8] sm:$0xf] (!%p191_p9) }
   0xe   : > { %194 = sbr.rel (%p191_p9) target bundleno = 785 (0x311), region = 40  ;;  %1117 = vset.pattern.permute.xlu1 (!%p191_p9), %v1182_v0  ;;  %1116 = vset.pattern.permute.xlu0 (!%p191_p9), %v1182_v0  ;;  %v1010_v10 = vld [vmem:[%s1591_s1 + $0x4] sm:$0xf] (!%p191_p9)  ;;  %v1012_v13 = vld [vmem:[%s1591_s1 + $0xc] sm:$0xf] (!%p191_p9)  ;;  %s1185_s17 = smov (!%p191_p9), 56  }
   0xf   : > { %1039 = vmatprep.subr.mxu0 (!%p191_p9), %v1183_v1  ;;  %1044 = vmatprep.subr.mxu1 (!%p191_p9), %v1183_v1  ;;  %v1298_v7 = vand.u32 (!%p191_p9), 127, %v227_v2  ;;  %v1013_v16 = vld [vmem:[%s1591_s1 + $0x10] sm:$0xf] (!%p191_p9)  ;;  %s1186_s26 = smov (!%p191_p9), 57   ;;  %v1014_v18 = vld [vmem:[%s1591_s1 + $0x14] sm:$0xf] (!%p191_p9) }
  0x10   : > { %v1015_v19 = vld [vmem:[%s1591_s1 + $0x18] sm:$0xf] (!%p191_p9)  ;;  %vm245_vm5 = vcmask (!%p191_p9), 1048064   ;;  %v1016_v27 = vld [vmem:[%s1591_s1 + $0x1c] sm:$0xf] (!%p191_p9)  ;;  %s1188_s15 = smov (!%p191_p9), 7  }
  0x11   : > { %v233_v8 = vand.u32 (!%p191_p9), 7, %v1298_v7  ;;  %vm241_vm0 = vcmp.ge.s32.totalorder (!%p191_p9), %v1298_v7, 8  ;;  %vm242_vm6 = vcmp.lt.s32.totalorder (!%p191_p9), %v1298_v7, 56  ;;  %v1017_v29 = vld [vmem:[%s1591_s1 + $0x20] sm:$0xf] (!%p191_p9)  ;;  %s1189_s16 = smov (!%p191_p9), 1  }
  0x12   : > { %v1003_v12 = vsel (!%p191_p9), %vm241_vm0, 1.0, %v1183_v1  ;;  %v337_v33 = vld [vmem:[%s1591_s1] sm:$0xf] (!%p191_p9)  ;;  %v1008_v34 = vsel (!%p191_p9), %vm242_vm6, 1.0, %v1183_v1  ;;  %s1192_s7 = smov (!%p191_p9), 127   ;;  %s1193_s8 = smov (!%p191_p9), 120  }
  0x13   : > { %vm1312_vm1 = vcmp.le.s32.totalorder (!%p191_p9), %v233_v8, 6  ;;  %vm1322_vm3 = vcmp.ge.s32.totalorder (!%p191_p9), %v233_v8, 1  ;;  %v335_v36 = vld [vmem:[%s1592_s2] sm:$0xf] (!%p191_p9)  ;;  %vm1195_vm9 = vmmov (!%p191_p9), 0   ;;  %s1197_s11 = smov (!%p191_p9), 73  }
  0x14   : > { %vm274_vm2 = vmand (!%p191_p9), %vm241_vm0, %vm1312_vm1  ;;  %v1005_v23 = vsel (!%p191_p9), %vm1322_vm3, 1.0, %v1183_v1  ;;  %v1006_v32 = vsel (!%p191_p9), %vm1312_vm1, 1.0, %v1183_v1  ;;  %1041 = vmatprep.mubr.msk.f32.mxu0 (!%p191_p9), %vm1195_vm9, %v1183_v1  ;;  %1046 = vmatprep.mubr.msk.f32.mxu1 (!%p191_p9), %vm1195_vm9, %v1183_v1  ;;  %s1198_s12 = smov (!%p191_p9), 72   ;;  %vm469_vm13 = vcmask (!%p191_p9), 1043456   ;;  %vm465_vm14 = vcmask (!%p191_p9), 31744   ;;  %s215_s25 = sand.u32 (!%p191_p9), 1, %s1172_s19  }
  0x15   : > { %s219_s30 = scalar_select %p218_p10, %s1252_s22, 1  ;;  %vm1329_vm4 = vmand %vm241_vm0, %vm1322_vm3  ;;  %v1004_v17 = vsel %vm274_vm2, 1.0, %v1183_v1 }
  0x16   : > { %vm310_vm7 = vmand %vm242_vm6, %vm1322_vm3  ;;  %v1002_v37 = vsel %vm1329_vm4, 1.0, %v1183_v1  ;;  %vm920_vm4 = vcmask 523264  }
  0x17   : > { %s1030_s6 = sshll.u32 %s219_s30, 4  ;;  %v1007_v31 = vsel %vm310_vm7, 1.0, %v1183_v1  ;;  %vm326_vm8 = vmand %vm242_vm6, %vm1312_vm1 }
  0x18   : > { %s222_s9 = scalar_lea.vmem %s1590_s0, %s1030_s6  ;;  %s1191_s6 = smov 55  }
  0x19   : > { %v1286_v3 = vld [vmem:[%s222_s9 + $0x8] sm:$0xf]  ;;  %v1288_v4 = vld [vmem:[%s222_s9 + $0x4] sm:$0xf]  ;;  %v1294_v5 = vld [vmem:[%s222_s9 + $0xc] sm:$0xf] }
  0x1a   : > { %260 = vrot.lane.b32.xlu0 %v1286_v3, %s1184_s10  ;;  %282 = vrot.lane.b32.xlu1 %v1288_v4, %s1184_s10  ;;  %v1296_v6 = vld [vmem:[%s222_s9] sm:$0xf]  ;;  %s1187_s9 = smov 63  }
  0x1e   : > { %246 = vrot.lane.b32.xlu0 %v1294_v5, %s1184_s10  ;;  %295 = vrot.lane.b32.xlu1 %v1296_v6, %s1184_s10 }
  0x22   : > { %361 = vperm.xlu1 %1117, %v1011_v9   ;;  %348 = vperm.xlu0 %1116, %v1010_v10  }
  0x26   : > { %269 = vrot.lane.b32.xlu1 %v1003_v12, %s1185_s17  ;;  %374 = vperm.xlu0 %1116, %v1012_v13  }
  0x2a   : > { %387 = vperm.xlu1 %1117, %v1013_v16   ;;  %278 = vrot.lane.b32.xlu0 %v1004_v17, %s1186_s26  ;;  %s1027_s26 = sshll.u32 %s1252_s22, 7  ;;  %s1200_s22 = smov [#allocation2]  }
  0x2e   : > { %400 = vperm.xlu1 %1117, %v1014_v18   ;;  %413 = vperm.xlu0 %1116, %v1015_v19  }
  0x8c   : > { %v261_v20 = vpop.permute.xlu0 %260  ;;  %v283_v22 = vpop.permute.xlu1 %282 }
  0x8d   : > { %v262_v21 = vsel %vm245_vm5, %v261_v20, %v1286_v3  ;;  %v284_v26 = vsel %vm245_vm5, %v283_v22, %v1288_v4 }
  0x8e   : > { %263 = vrot.lane.b32.xlu1 %v262_v21, %s1184_s10 }
  0x90   : > { %v247_v24 = vpop.permute.xlu0 %246  ;;  %v296_v28 = vpop.permute.xlu1 %295 }
  0x91   : > { %v248_v25 = vsel %vm245_vm5, %v247_v24, %v1294_v5  ;;  %v297_v30 = vsel %vm245_vm5, %v296_v28, %v1296_v6 }
  0x92   : > { %249 = vrot.lane.b32.xlu0 %v248_v25, %s1184_s10  ;;  %291 = vrot.lane.b32.xlu1 %v1005_v23, %s1187_s9 }
  0x96   : > { %285 = vrot.lane.b32.xlu0 %v284_v26, %s1184_s10  ;;  %426 = vperm.xlu1 %1117, %v1016_v27  }
  0x9a   : > { %439 = vperm.xlu1 %1117, %v1017_v29   ;;  %298 = vrot.lane.b32.xlu0 %v297_v30, %s1184_s10  ;;  %s1190_s10 = smov 8  }
  0x9e   : > { %314 = vrot.lane.b32.xlu1 %v1007_v31, %s1188_s15  ;;  %304 = vrot.lane.b32.xlu0 %v1006_v32, %s1189_s16  ;;  %s1199_s15 = smov 65  }
  0xa1   : > { %v1380_v35 = vpop.permute.xlu1 %361  ;;  %v1388_v38 = vpop.permute.xlu0 %348 }
  0xa2   : > { %340 = vperm.xlu1 %1117, %v337_v33   ;;  %321 = vrot.lane.b32.xlu0 %v1008_v34, %s1190_s10  ;;  %v674_v40 = vmul.f32 %v1388_v38, %v1296_v6  ;;  %v680_v45 = vmul.f32 %v1380_v35, %v1288_v4  ;;  %s999_s10 = sshll.u32 %s215_s25, 3 }
  0xa3   : > { %s217_s30 = scalar_lea.vmem [#allocation2], %s999_s10 }
  0xa5   : > { %v270_v39 = vpop.permute.xlu1 %269  ;;  %v1393_v41 = vpop.permute.xlu0 %374 }
  0xa6   : > { %450 = vperm.xlu1 %1117, %v335_v36   ;;  %256 = vrot.lane.b32.xlu0 %v1002_v37, %s1191_s6  ;;  %v554_v44 = vmul.f32 %v1393_v41, %v1296_v6 }
  0xa9   : > { %v1395_v42 = vpop.permute.xlu1 %387  ;;  %v279_v49 = vpop.permute.xlu0 %278 }
  0xaa   : > { %v390_v43 = vmul.f32 %v1395_v42, %v1296_v6  ;;  %676 = vrot.lane.b32.xlu1 %v674_v40, %s1187_s9  ;;  %v560_v48 = vmul.f32 %v1395_v42, %v1288_v4  ;;  %v688_v50 = vmul.f32 %v1395_v42, %v1286_v3 }
  0xac   : > { %392 = vrot.lane.b32.xlu0 %v390_v43, %s1191_s6 }
  0xad   : > { %v1405_v46 = vpop.permute.xlu1 %400  ;;  %v1417_v51 = vpop.permute.xlu0 %413 }
  0xae   : > { %556 = vrot.lane.b32.xlu1 %v554_v44, %s1185_s17  ;;  %v403_v47 = vmul.f32 %v1405_v46, %v1288_v4  ;;  %v572_v52 = vmul.f32 %v1417_v51, %v1286_v3  ;;  %v694_v8 = vmul.f32 %v1405_v46, %v1294_v5 }
  0xb0   : > { %682 = vrot.lane.b32.xlu0 %v680_v45, %s1187_s9 }
  0xb2   : > { %405 = vrot.lane.b32.xlu1 %v403_v47, %s1191_s6  ;;  %v1009_v47 = vsel %vm326_vm8, 1.0, %v1183_v1 }
  0xb4   : > { %562 = vrot.lane.b32.xlu0 %v560_v48, %s1185_s17 }
  0xb8   : > { %690 = vrot.lane.b32.xlu0 %v688_v50, %s1187_s9 }
  0xbc   : > { %574 = vrot.lane.b32.xlu0 %v572_v52, %s1185_s17 }
 0x100   : > { %v264_v54 = vpop.permute.xlu1 %263 }
 0x101   : > { %v265_v63 = vsel %vm245_vm5, %v264_v54, %v1286_v3 }
 0x102   : > { %v272_v9 = vmul.f32 %v270_v39, %v265_v63  ;;  %v281_v10 = vmul.f32 %v279_v49, %v265_v63 }
 0x104   : > { %v250_v53 = vpop.permute.xlu0 %249  ;;  %v292_v56 = vpop.permute.xlu1 %291  ;;  %v548_v19 = vmul.f32 %v1380_v35, %v281_v10  ;;  %v351_v20 = vmul.f32 %v1388_v38, %v272_v9 }
 0x105   : > { %v1429_v60 = vsel %vm245_vm5, %v250_v53, %v1294_v5 }
 0x106   : > { %v273_v0 = vmul.f32 %v270_v39, %v1429_v60  ;;  %v308_v21 = vmul.f32 %v292_v56, %v1429_v60 }
 0x108   : > { %v286_v55 = vpop.permute.xlu0 %285  ;;  %v364_v14 = vmul.f32 %v1380_v35, %v273_v0  ;;  %v546_v23 = vmul.f32 %v1388_v38, %v273_v0  ;;  %v416_v29 = vmul.f32 %v1417_v51, %v308_v21  ;;  %v686_v43 = vmul.f32 %v1393_v41, %v308_v21 }
 0x109   : > { %v287_v16 = vsel %vm245_vm5, %v286_v55, %v1288_v4 }
 0x10a   : > { %v294_v22 = vmul.f32 %v292_v56, %v287_v16 }
 0x10c   : > { %v299_v57 = vpop.permute.xlu0 %298  ;;  %v377_v32 = vmul.f32 %v1393_v41, %v294_v22 }
 0x10d   : > { %v1461_v25 = vsel %vm245_vm5, %v299_v57, %v1296_v6 }
 0x110   : > { %v305_v61 = vpop.permute.xlu0 %304 }
 0x111   : > { %v307_v30 = vmul.f32 %v305_v61, %v1461_v25  ;;  %v309_v44 = vmul.f32 %v305_v61, %v265_v63 }
 0x113   : > { %v566_v36 = vmul.f32 %v1405_v46, %v307_v30  ;;  %v804_v53 = vmul.f32 %v1380_v35, %v307_v30  ;;  %v814_v54 = vmul.f32 %v1405_v46, %v309_v44 }
 0x114   : > { %v322_v12 = vpop.permute.xlu0 %321 }
 0x115   : > { %v1423_v58 = vpop.permute.xlu1 %426  ;;  %v324_v48 = vmul.f32 %v322_v12, %v1461_v25  ;;  %v325_v11 = vmul.f32 %v322_v12, %v287_v16 }
 0x116   : > { %v429_v59 = vmul.f32 %v1423_v58, %v1286_v3  ;;  %v578_v15 = vmul.f32 %v1423_v58, %v1294_v5 }
 0x117   : > { %v706_v52 = vmul.f32 %v1423_v58, %v324_v48  ;;  %v820_v55 = vmul.f32 %v1417_v51, %v324_v48  ;;  %v826_v56 = vmul.f32 %v1423_v58, %v325_v11  ;;  %v802_v48 = vmul.f32 %v1388_v38, %v1288_v4 }
 0x118   : > { %431 = vrot.lane.b32.xlu1 %v429_v59, %s1191_s6  ;;  %v1450_v17 = vpop.permute.xlu0 %256  ;;  %v810_v4 = vmul.f32 %v1393_v41, %v1286_v3 }
 0x119   : > { %v1432_v62 = vpop.permute.xlu1 %439  ;;  %v259_v10 = vmul.f32 %v1450_v17, %v1429_v60 }
 0x11a   : > { %v442_v2 = vmul.f32 %v1432_v62, %v1294_v5  ;;  %v584_v50 = vmul.f32 %v1432_v62, %v309_v44  ;;  %v712_v7 = vmul.f32 %v1432_v62, %v325_v11 }
 0x11c   : > { %444 = vrot.lane.b32.xlu0 %v442_v2, %s1191_s6  ;;  %696 = vrot.lane.b32.xlu1 %v694_v8, %s1187_s9  ;;  %s1194_s9 = smov 9  }
 0x11d   : > { %v315_v13 = vpop.permute.xlu1 %314 }
 0x11e   : > { %v393_v27 = vpop.permute.xlu0 %392  ;;  %v317_v31 = vmul.f32 %v315_v13, %v287_v16 }
 0x120   : > { %366 = vrot.lane.b32.xlu0 %v364_v14, %s1192_s7  ;;  %580 = vrot.lane.b32.xlu1 %v578_v15, %s1185_s17  ;;  %v700_v37 = vmul.f32 %v1417_v51, %v317_v31 }
 0x121   : > { %v1452_v18 = vpop.permute.xlu1 %340 }
 0x122   : > { %v545_v24 = vmul.f32 %v1452_v18, %v272_v9  ;;  %v673_v33 = vmul.f32 %v1452_v18, %v294_v22  ;;  %v683_v40 = vpop.permute.xlu0 %682  ;;  %v343_v51 = vmul.f32 %v1452_v18, %v259_v10  ;;  %v334_v10 = vld [vmem:[%s1593_s3] sm:$0xff] }
 0x124   : > { %550 = vrot.lane.b32.xlu0 %v548_v19, %s1192_s7  ;;  %353 = vrot.lane.b32.xlu1 %v351_v20, %s1192_s7  ;;  %v547_v26 = vadd.f32 %v546_v23, %v545_v24 }
 0x125   : > { %v1465_v28 = vpop.permute.xlu1 %450 }
 0x126   : > { %v563_v57 = vpop.permute.xlu0 %562 }
 0x128   : > { %418 = vrot.lane.b32.xlu0 %v416_v29, %s1193_s8  ;;  %379 = vrot.lane.b32.xlu1 %v377_v32, %s1193_s8 }
 0x129   : > { %v677_v34 = vpop.permute.xlu1 %676 }
 0x12a   : > { %v679_v39 = vadd.f32 %v677_v34, %v673_v33  ;;  %v691_v61 = vpop.permute.xlu0 %690 }
 0x12c   : > { %v685_v45 = vadd.f32 %v683_v40, %v679_v39  ;;  %702 = vrot.lane.b32.xlu0 %v700_v37, %s1185_s17  ;;  %568 = vrot.lane.b32.xlu1 %v566_v36, %s1191_s6  ;;  %v801_v39 = vmul.f32 %v1452_v18, %v1296_v6  ;;  %s1196_s17 = smov 119  }
 0x12d   : > { %v557_v59 = vpop.permute.xlu1 %556 }
 0x12e   : > { %v687_v49 = vadd.f32 %v686_v43, %v685_v45  ;;  %v575_v0 = vpop.permute.xlu0 %574 }
 0x130   : > { %586 = vrot.lane.b32.xlu0 %v584_v50, %s1191_s6  ;;  %330 = vrot.lane.b32.xlu1 %v1009_v47, %s1194_s9  ;;  %v693_v32 = vadd.f32 %v691_v61, %v687_v49  ;;  %v336_v61 = vld [vmem:[%s1594_s4] sm:$0xff]  ;;  %s1546_s9 = scalar_lea.hbm %s1595_s5, %s1027_s26 }
 0x131   : > { %v406_v63 = vpop.permute.xlu1 %405 }
 0x134   : > { %714 = vrot.lane.b32.xlu0 %v712_v7, %s1191_s6  ;;  %708 = vrot.lane.b32.xlu1 %v706_v52, %s1191_s6  ;;  %v803_v7 = vadd.f32 %v802_v48, %v801_v39  ;;  %s936_s6 = sshll.u32 %s217_s30, 4  ;;  %s1548_s6 = int_to_ptr.vmem [resolvable:$true] %s936_s6 }
 0x138   : > { %816 = vrot.lane.b32.xlu0 %v814_v54, %s1192_s7  ;;  %806 = vrot.lane.b32.xlu1 %v804_v53, %s1192_s7 }
 0x13c   : > { %828 = vrot.lane.b32.xlu0 %v826_v56, %s1193_s8  ;;  %822 = vrot.lane.b32.xlu1 %v820_v55, %s1193_s8  ;;  %v812_v56 = vmul.f32 %v1395_v42, %v1294_v5 }
 0x18a   : > { %v432_v35 = vpop.permute.xlu1 %431 }
 0x18e   : > { %v445_v2 = vpop.permute.xlu0 %444  ;;  %v697_v46 = vpop.permute.xlu1 %696 }
 0x18f   : > { %v699_v34 = vadd.f32 %v697_v46, %v693_v32 }
 0x192   : > { %v367_v8 = vpop.permute.xlu0 %366  ;;  %v581_v9 = vpop.permute.xlu1 %580 }
 0x196   : > { %v551_v58 = vpop.permute.xlu0 %550  ;;  %v354_v12 = vpop.permute.xlu1 %353 }
 0x197   : > { %v553_v13 = vadd.f32 %v551_v58, %v547_v26  ;;  %v356_v14 = vadd.f32 %v354_v12, %v343_v51 }
 0x199   : > { %v559_v15 = vadd.f32 %v557_v59, %v553_v13  ;;  %v369_v16 = vadd.f32 %v367_v8, %v356_v14 }
 0x19a   : > { %v419_v19 = vpop.permute.xlu0 %418  ;;  %v380_v20 = vpop.permute.xlu1 %379 }
 0x19b   : > { %v382_v21 = vadd.f32 %v380_v20, %v369_v16  ;;  %v565_v23 = vadd.f32 %v563_v57, %v559_v15 }
 0x19d   : > { %v395_v22 = vadd.f32 %v393_v27, %v382_v21 }
 0x19e   : > { %v703_v24 = vpop.permute.xlu0 %702  ;;  %v569_v29 = vpop.permute.xlu1 %568 }
 0x19f   : > { %v408_v30 = vadd.f32 %v406_v63, %v395_v22  ;;  %v571_v31 = vadd.f32 %v569_v29, %v565_v23  ;;  %v705_v40 = vadd.f32 %v703_v24, %v699_v34 }
 0x1a1   : > { %v421_v33 = vadd.f32 %v419_v19, %v408_v30  ;;  %v577_v60 = vadd.f32 %v575_v0, %v571_v31 }
 0x1a2   : > { %v587_v17 = vpop.permute.xlu0 %586  ;;  %v331_v26 = vpop.permute.xlu1 %330 }
 0x1a3   : > { %v434_v36 = vadd.f32 %v432_v35, %v421_v33  ;;  %v583_v27 = vadd.f32 %v581_v9, %v577_v60  ;;  %v333_v37 = vmul.f32 %v331_v26, %v1461_v25 }
 0x1a5   : > { %v589_v43 = vadd.f32 %v587_v17, %v583_v27  ;;  %v832_v44 = vmul.f32 %v1432_v62, %v333_v37  ;;  %v447_v45 = vadd.f32 %v445_v2, %v434_v36 }
 0x1a6   : > { %v709_v47 = vpop.permute.xlu1 %708  ;;  %v715_v25 = vpop.permute.xlu0 %714 }
 0x1a7   : > { %v590_v49 = vadd.f32 %v589_v43, %v1465_v28  ;;  %v711_v50 = vadd.f32 %v709_v47, %v705_v40  ;;  %834 = vrot.lane.b32.xlu1 %v832_v44, %s1196_s17  ;;  %v453_v11 = vadd.f32 %v1465_v28, %v447_v45  ;;  %s923_s17 = scalar_lea.sflag [#allocation3], %s215_s25 }
 0x1a9   : > { %v717_v52 = vadd.f32 %v715_v25, %v711_v50  ;;  %vm454_vm10 = vcmp.ge.f32.partialorder %v453_v11, 0.0  ;;  %v455_v6 = vmul.f32 0.2, %v453_v11  ;;  %vm591_vm11 = vcmp.ge.f32.partialorder %v590_v49, 0.0 }
 0x1aa   : > { %v807_v18 = vpop.permute.xlu1 %806  ;;  %v592_v62 = vmul.f32 0.2, %v590_v49  ;;  %v817_v3 = vpop.permute.xlu0 %816 }
 0x1ab   : > { %v718_v53 = vadd.f32 %v717_v52, %v1465_v28  ;;  %v809_v38 = vadd.f32 %v807_v18, %v803_v7  ;;  %v456_v54 = vsel %vm454_vm10, %v453_v11, %v455_v6 }
 0x1ac   : > { %463 = vrot.lane.b32.xlu0 %v456_v54, %s1197_s11  ;;  %v593_v55 = vsel %vm591_vm11, %v590_v49, %v592_v62  ;;  %s1118_s11 = scalar_lea.vmem %s1548_s6, 128 }
 0x1ad   : > { %v811_v57 = vadd.f32 %v810_v4, %v809_v38  ;;  %595 = vrot.lane.b32.xlu1 %v593_v55, %s1198_s12  ;;  %vm719_vm12 = vcmp.ge.f32.partialorder %v718_v53, 0.0  ;;  %v720_v59 = vmul.f32 0.2, %v718_v53  ;;  %p1119_p11 = scmp.ne.s32.totalorder %s1548_s6, %s1118_s11  ;;  %s1122_s12 = sshll.u32 %s1200_s22, 4  ;;  %s1123_s12 = int_to_ptr.vmem [resolvable:$false] %s1122_s12 }
 0x1ae   : > { %v823_v35 = vpop.permute.xlu1 %822  ;;  %v829_v46 = vpop.permute.xlu0 %828  ;;  %s1124_s13 = scalar_lea.vmem %s1123_s12, 256  ;;  %p1125_p0 = scmp.lt.s32.totalorder %s1548_s6, %s1123_s12 }
 0x1af   : > { %v813_v63 = vadd.f32 %v812_v56, %v811_v57  ;;  %v721_v0 = vsel %vm719_vm12, %v718_v53, %v720_v59  ;;  %p1120_p12 = pnand %p1119_p11, %p1269_p5  ;;  %p1126_p1 = scmp.lt.s32.totalorder %s1124_s13, %s1118_s11 }
 0x1b0   : > { %723 = vrot.lane.b32.xlu0 %v721_v0, %s1199_s15 }
 0x1b1   : > { %459 = vperm.xlu1 %1117, %v336_v61   ;;  %v819_v41 = vadd.f32 %v817_v3, %v813_v63  ;;  %p1121_p13 = pneg %p1120_p12  ;;  %p1127_p2 = por %p1126_p1, %p1125_p0 }
 0x1b3   : > { %v825_v2 = vadd.f32 %v823_v35, %v819_v41  ;;  %p1128_p3 = pnand %p1127_p2, %p1121_p13 }
 0x1b5   : > { %v831_v5 = vadd.f32 %v829_v46, %v825_v2 }
 0x219   : > { %v835_v42 = vpop.permute.xlu1 %834 }
 0x21a   : > { %v837_v8 = vadd.f32 %v835_v42, %v831_v5 }
 0x21c   : > { %v838_v9 = vadd.f32 %v837_v8, %v1465_v28 }
 0x21e   : > { %vm839_vm15 = vcmp.ge.f32.partialorder %v838_v9, 0.0  ;;  %v840_v51 = vmul.f32 0.2, %v838_v9  ;;  %v464_v58 = vpop.permute.xlu0 %463 }
 0x21f   : > { %v596_v12 = vpop.permute.xlu1 %595  ;;  %1040 = vmatpush3.msk.msra.mxu0 %vm469_vm13, %v464_v58 }
 0x220   : > { %1045 = vmatpush3.msk.msra.mxu1 %vm469_vm13, %v596_v12  ;;  %1042 = vmatmul.mubr.msk.f32.vlgmr.msra.gmra.mrb[0].mxu0 %vm465_vm14, %v334_v10  ;;  %v841_v13 = vsel %vm839_vm15, %v838_v9, %v840_v51 }
 0x221   : > { %1047 = vmatmul.mubr.msk.f32.vlgmr.msra.gmra.mrb[0].mxu1 %vm465_vm14, %v334_v10  ;;  %1054 = vmatprep.subr.mxu1 %v1183_v1 }
 0x222   : > { %1055 = vmatpush3.msk.msra.mxu1 %vm469_vm13, %v841_v13  ;;  %1049 = vmatprep.subr.mxu0 %v1183_v1  ;;  %v724_v28 = vpop.permute.xlu0 %723 }
 0x223   : > { %1050 = vmatpush3.msk.msra.mxu0 %vm469_vm13, %v724_v28  ;;  %1051 = vmatprep.mubr.msk.f32.mxu0 %vm1195_vm9, %v1183_v1 }
 0x224   : > { %1056 = vmatprep.mubr.msk.f32.mxu1 %vm1195_vm9, %v1183_v1  ;;  %1052 = vmatmul.mubr.msk.f32.vlgmr.msra.gmra.mrb[2].mxu0 %vm465_vm14, %v334_v10 }
 0x225   : > { %1057 = vmatmul.mubr.msk.f32.vlgmr.msra.gmra.mrb[2].mxu1 %vm465_vm14, %v334_v10 }
 0x230   : > { %v460_v14 = vpop.permute.xlu1 %459 }
 0x2f3   : > { %v538_v15 = vpop.f32.mrb[0].mxu0 }
 0x2f4   : > { %v539_v16 = vadd.f32 %v538_v15, %v460_v14  ;;  %v665_v19 = vpop.f32.mrb[0].mxu1  ;;  %v1043_v20 = vpop.f32.mrb[1].mxu0 }
 0x2f5   : > { %v666_v21 = vadd.f32 %v665_v19, %v460_v14  ;;  %v1048_v22 = vpop.f32.mrb[1].mxu1 }
 0x2f6   : > { %vm542_vm0 = vcmp.ge.f32.partialorder %v539_v16, 0.0  ;;  %v543_v23 = vmul.f32 0.2, %v539_v16 }
 0x2f7   : > { %vm669_vm1 = vcmp.ge.f32.partialorder %v666_v21, 0.0  ;;  %v670_v24 = vmul.f32 0.2, %v666_v21  ;;  %v793_v29 = vpop.f32.mrb[2].mxu0 }
 0x2f8   : > { %v544_v30 = vsel %vm542_vm0, %v539_v16, %v543_v23  ;;  %v794_v1 = vadd.f32 %v793_v29, %v460_v14  ;;  %v911_v31 = vpop.f32.mrb[2].mxu1  ;;  %v1053_v32 = vpop.f32.mrb[3].mxu0 }
 0x2f9   : > { %v671_v33 = vsel %vm669_vm1, %v666_v21, %v670_v24  ;;  %v912_v60 = vadd.f32 %v911_v31, %v460_v14  ;;  %v1058_v17 = vpop.f32.mrb[3].mxu1 }
 0x2fa   : > { %v672_v26 = vadd.f32 %v671_v33, %v544_v30  ;;  %vm797_vm2 = vcmp.ge.f32.partialorder %v794_v1, 0.0  ;;  %v798_v34 = vmul.f32 0.2, %v794_v1 }
 0x2fb   : > { %vm915_vm3 = vcmp.ge.f32.partialorder %v912_v60, 0.0  ;;  %v916_v36 = vmul.f32 0.2, %v912_v60 }
 0x2fc   : > { %v799_v27 = vsel %vm797_vm2, %v794_v1, %v798_v34 }
 0x2fd   : > { %v800_v37 = vadd.f32 %v799_v27, %v672_v26  ;;  %v917_v39 = vsel %vm915_vm3, %v912_v60, %v916_v36 }
 0x2ff   : > { %v918_v40 = vadd.f32 %v917_v39, %v800_v37 }
 0x301   : > { %v919_v43 = vmul.f32 0.25, %v918_v40 }
 0x303   : > { %921 = vst.msk [vmem:[%s217_s30] sm:$0xff] %vm920_vm4, %v919_v43 }
 0x304   : > { %1131 = shalt.err (!%p1128_p3)
}
 0x305   : > { %s1132_s14 = scalar_lea.hbm %s1546_s9, 128  ;;  %s1136_s23 = scalar_lea.hbm %s1595_s5, 256 }
 0x306   : > { %p1133_p4 = scmp.ne.s32.totalorder %s1546_s9, %s1132_s14  ;;  %p1137_p9 = scmp.lt.u32.totalorder %s1546_s9, %s1595_s5 }
 0x307   : > { %p1138_p10 = scmp.lt.u32.totalorder %s1136_s23, %s1132_s14  ;;  %p1140_p12 = scmp.lt.u32.totalorder %s1132_s14, %s1546_s9 }
 0x308   : > { %p1134_p7 = pnand %p1133_p4, %p1269_p5 }
 0x309   : > { %p1139_p11 = por %p1138_p10, %p1137_p9 }
 0x30a   : > { %p1135_p8 = pneg %p1134_p7 }
 0x30b   : > { %p1141_p13 = por %p1140_p12, %p1139_p11 }
 0x30d   : > { %p1142_p0 = pnand %p1141_p13, %p1135_p8 }
 0x30f   : > { %1145 = shalt.err (!%p1142_p0)
}
 0x310   : > { %1059 = dma.vmem_to_hbm [thread:$0]  (%p1269_p5), %s1548_s6, 128, %s1546_s9, %s923_s17  }
 0x311 PF: > { %p1065_p1 = scmp.ge.s32.totalorder %s1180_s21, 2  ;;  %s948_s26 = sand.u32 1, %s1168_s18  }
 0x312   : > { %s949_s30 = scalar_lea.sflag [#allocation3], %s948_s26 }
 0x313   : > { %p1062_p2 = pnand %p1065_p1, %p1273_p6 }
 0x315   : > { %1163 = dma.done.wait (!%p1062_p2), %s949_s30, 128  }
 0x316   : > { %1165 = vsyncadd (!%p1062_p2), %s949_s30, 4294967168  ;;  %p15_p3 = scmp.ge.s32.totalorder %s1256_s24, 4   ;;  %s1604_s18 = smov %s1172_s19 }
 0x317   : > { %s1605_s19 = smov %s1176_s20  ;;  %s1606_s20 = smov %s1267_s27 }
 0x318   : > { %s1607_s21 = smov %s1256_s24  ;;  %17 = sbr.rel (!%p15_p3) target bundleno = 3 (0x3), region = 83 }
 0x31f   :  { %954 = vsyncpa [#allocation3], 1 }
 0x320   :  { %956 = vsyncpa [#allocation3 + $0x1], 1 }

// kernel: tpu_custom_call.1
= control target key start
LH: loop header
LB: loop body
LE: loop exit
PB: predicated region body
PF: predicated region fallthrough
CT: control target
= control target key end

     0   :  { %10 = vsyncpa [#allocation3], 0  ;;  %s1590_s0 = inlined_call_operand.vmem [shape: f32[2,4,4,64], index: 0, kind: input, shape index: {}]   ;;  %s1591_s1 = inlined_call_operand.vmem [shape: f32[9,4,1], index: 1, kind: input, shape index: {}]   ;;  %s1592_s2 = inlined_call_operand.vmem [shape: f32[4,1], index: 2, kind: input, shape index: {}]   ;;  %s1593_s3 = inlined_call_operand.vmem [shape: f32[8,4], index: 3, kind: input, shape index: {}]   ;;  %s1594_s4 = inlined_call_operand.vmem [shape: f32[8,1], index: 4, kind: input, shape index: {}]   ;;  %s1595_s5 = inlined_call_operand.hbm [shape: f32[2,8,64], index: 5, kind: output, shape index: {}]  }
   0x1   :  { %12 = vsyncpa [#allocation3 + $0x1], 0  ;;  %s1231_s18 = smov 0   ;;  %s1233_s19 = smov 0  }
   0x2   :  { %s1235_s20 = smov 0   ;;  %s1237_s21 = smov 0  }
   0x3 LB: > { %s1252_s22 = sadd.s32 4294967295, %s1180_s21   ;;  %s995_s23 = sadd.s32 4294967294, %s1180_s21   ;;  %s1180_s21 = sphi %s1237_s21, %s1607_s21   ;;  %s1176_s20 = sphi %s1235_s20, %s1606_s20   ;;  %s1172_s19 = sphi %s1233_s19, %s1605_s19   ;;  %s1168_s18 = sphi %s1231_s18, %s1604_s18  }
   0x4   : > { %s1256_s24 = sadd.s32 1, %s1180_s21   ;;  %s135_s25 = sadd.s32 1, %s1176_s20 }
   0x5   : > { %s132_s26 = ssub.s32 %s1180_s21, %s1256_s24  ;;  %p145_p0 = scmp.ne.s32.totalorder %s1176_s20, %s1172_s19 }
   0x6   : > { %p133_p1 = scmp.eq.s32.totalorder %s132_s26, 0  ;;  %p146_p2 = scmp.eq.s32.totalorder %s1252_s22, 1 }
   0x7   : > { %p151_p3 = scmp.ne.s32.totalorder %s1172_s19, %s1168_s18  ;;  %p152_p4 = scmp.eq.s32.totalorder %s995_s23, 1 }
   0x8   : > { %s1267_s27 = scalar_select %p133_p1, %s1176_s20, %s135_s25  }
   0x9   : > { %p1269_p5 = por %p146_p2, %p145_p0  ;;  %p1273_p6 = por %p152_p4, %p151_p3 }
   0xa   : > { %p998_p7 = scmp.ge.s32.totalorder %s1180_s21, 1  ;;  %p190_p8 = scmp.lt.s32.totalorder %s1180_s21, 3 }
   0xc   : > { %p191_p9 = pnand %p998_p7, %p190_p8 }
   0xd   : > { %p218_p10 = scmp.lt.s32.totalorder (!%p191_p9), %s1252_s22, 1  ;;  %v1182_v0 = vmov (!%p191_p9), 0   ;;  %v1183_v1 = vmov (!%p191_p9), 0.0   ;;  %v227_v2 = vlaneseq (!%p191_p9)  ;;  %s1184_s10 = smov (!%p191_p9), 64   ;;  %v1011_v9 = vld [vmem:[%s1591_s1 + $0x8] sm:$0xf] (!%p191_p9) }
   0xe   : > { %194 = sbr.rel (%p191_p9) target bundleno = 785 (0x311), region = 40  ;;  %1117 = vset.pattern.permute.xlu1 (!%p191_p9), %v1182_v0  ;;  %1116 = vset.pattern.permute.xlu0 (!%p191_p9), %v1182_v0  ;;  %v1010_v10 = vld [vmem:[%s1591_s1 + $0x4] sm:$0xf] (!%p191_p9)  ;;  %v1012_v13 = vld [vmem:[%s1591_s1 + $0xc] sm:$0xf] (!%p191_p9)  ;;  %s1185_s17 = smov (!%p191_p9), 56  }
   0xf   : > { %1039 = vmatprep.subr.mxu0 (!%p191_p9), %v1183_v1  ;;  %1044 = vmatprep.subr.mxu1 (!%p191_p9), %v1183_v1  ;;  %v1298_v7 = vand.u32 (!%p191_p9), 127, %v227_v2  ;;  %v1013_v16 = vld [vmem:[%s1591_s1 + $0x10] sm:$0xf] (!%p191_p9)  ;;  %s1186_s26 = smov (!%p191_p9), 57   ;;  %v1014_v18 = vld [vmem:[%s1591_s1 + $0x14] sm:$0xf] (!%p191_p9) }
  0x10   : > { %v1015_v19 = vld [vmem:[%s1591_s1 + $0x18] sm:$0xf] (!%p191_p9)  ;;  %vm245_vm5 = vcmask (!%p191_p9), 1048064   ;;  %v1016_v27 = vld [vmem:[%s1591_s1 + $0x1c] sm:$0xf] (!%p191_p9)  ;;  %s1188_s15 = smov (!%p191_p9), 7  }
  0x11   : > { %v233_v8 = vand.u32 (!%p191_p9), 7, %v1298_v7  ;;  %vm241_vm0 = vcmp.ge.s32.totalorder (!%p191_p9), %v1298_v7, 8  ;;  %vm242_vm6 = vcmp.lt.s32.totalorder (!%p191_p9), %v1298_v7, 56  ;;  %v1017_v29 = vld [vmem:[%s1591_s1 + $0x20] sm:$0xf] (!%p191_p9)  ;;  %s1189_s16 = smov (!%p191_p9), 1  }
  0x12   : > { %v1003_v12 = vsel (!%p191_p9), %vm241_vm0, 1.0, %v1183_v1  ;;  %v337_v33 = vld [vmem:[%s1591_s1] sm:$0xf] (!%p191_p9)  ;;  %v1008_v34 = vsel (!%p191_p9), %vm242_vm6, 1.0, %v1183_v1  ;;  %s1192_s7 = smov (!%p191_p9), 127   ;;  %s1193_s8 = smov (!%p191_p9), 120  }
  0x13   : > { %vm1312_vm1 = vcmp.le.s32.totalorder (!%p191_p9), %v233_v8, 6  ;;  %vm1322_vm3 = vcmp.ge.s32.totalorder (!%p191_p9), %v233_v8, 1  ;;  %v335_v36 = vld [vmem:[%s1592_s2] sm:$0xf] (!%p191_p9)  ;;  %vm1195_vm9 = vmmov (!%p191_p9), 0   ;;  %s1197_s11 = smov (!%p191_p9), 73  }
  0x14   : > { %vm274_vm2 = vmand (!%p191_p9), %vm241_vm0, %vm1312_vm1  ;;  %v1005_v23 = vsel (!%p191_p9), %vm1322_vm3, 1.0, %v1183_v1  ;;  %v1006_v32 = vsel (!%p191_p9), %vm1312_vm1, 1.0, %v1183_v1  ;;  %1041 = vmatprep.mubr.msk.f32.mxu0 (!%p191_p9), %vm1195_vm9, %v1183_v1  ;;  %1046 = vmatprep.mubr.msk.f32.mxu1 (!%p191_p9), %vm1195_vm9, %v1183_v1  ;;  %s1198_s12 = smov (!%p191_p9), 72   ;;  %vm469_vm13 = vcmask (!%p191_p9), 1043456   ;;  %vm465_vm14 = vcmask (!%p191_p9), 31744   ;;  %s215_s25 = sand.u32 (!%p191_p9), 1, %s1172_s19  }
  0x15   : > { %s219_s30 = scalar_select %p218_p10, %s1252_s22, 1  ;;  %vm1329_vm4 = vmand %vm241_vm0, %vm1322_vm3  ;;  %v1004_v17 = vsel %vm274_vm2, 1.0, %v1183_v1 }
  0x16   : > { %vm310_vm7 = vmand %vm242_vm6, %vm1322_vm3  ;;  %v1002_v37 = vsel %vm1329_vm4, 1.0, %v1183_v1  ;;  %vm920_vm4 = vcmask 523264  }
  0x17   : > { %s1030_s6 = sshll.u32 %s219_s30, 4  ;;  %v1007_v31 = vsel %vm310_vm7, 1.0, %v1183_v1  ;;  %vm326_vm8 = vmand %vm242_vm6, %vm1312_vm1 }
  0x18   : > { %s222_s9 = scalar_lea.vmem %s1590_s0, %s1030_s6  ;;  %s1191_s6 = smov 55  }
  0x19   : > { %v1286_v3 = vld [vmem:[%s222_s9 + $0x8] sm:$0xf]  ;;  %v1288_v4 = vld [vmem:[%s222_s9 + $0x4] sm:$0xf]  ;;  %v1294_v5 = vld [vmem:[%s222_s9 + $0xc] sm:$0xf] }
  0x1a   : > { %260 = vrot.lane.b32.xlu0 %v1286_v3, %s1184_s10  ;;  %282 = vrot.lane.b32.xlu1 %v1288_v4, %s1184_s10  ;;  %v1296_v6 = vld [vmem:[%s222_s9] sm:$0xf]  ;;  %s1187_s9 = smov 63  }
  0x1e   : > { %246 = vrot.lane.b32.xlu0 %v1294_v5, %s1184_s10  ;;  %295 = vrot.lane.b32.xlu1 %v1296_v6, %s1184_s10 }
  0x22   : > { %361 = vperm.xlu1 %1117, %v1011_v9   ;;  %348 = vperm.xlu0 %1116, %v1010_v10  }
  0x26   : > { %269 = vrot.lane.b32.xlu1 %v1003_v12, %s1185_s17  ;;  %374 = vperm.xlu0 %1116, %v1012_v13  }
  0x2a   : > { %387 = vperm.xlu1 %1117, %v1013_v16   ;;  %278 = vrot.lane.b32.xlu0 %v1004_v17, %s1186_s26  ;;  %s1027_s26 = sshll.u32 %s1252_s22, 7  ;;  %s1200_s22 = smov [#allocation2]  }
  0x2e   : > { %400 = vperm.xlu1 %1117, %v1014_v18   ;;  %413 = vperm.xlu0 %1116, %v1015_v19  }
  0x8c   : > { %v261_v20 = vpop.permute.xlu0 %260  ;;  %v283_v22 = vpop.permute.xlu1 %282 }
  0x8d   : > { %v262_v21 = vsel %vm245_vm5, %v261_v20, %v1286_v3  ;;  %v284_v26 = vsel %vm245_vm5, %v283_v22, %v1288_v4 }
  0x8e   : > { %263 = vrot.lane.b32.xlu1 %v262_v21, %s1184_s10 }
  0x90   : > { %v247_v24 = vpop.permute.xlu0 %246  ;;  %v296_v28 = vpop.permute.xlu1 %295 }
  0x91   : > { %v248_v25 = vsel %vm245_vm5, %v247_v24, %v1294_v5  ;;  %v297_v30 = vsel %vm245_vm5, %v296_v28, %v1296_v6 }
  0x92   : > { %249 = vrot.lane.b32.xlu0 %v248_v25, %s1184_s10  ;;  %291 = vrot.lane.b32.xlu1 %v1005_v23, %s1187_s9 }
  0x96   : > { %285 = vrot.lane.b32.xlu0 %v284_v26, %s1184_s10  ;;  %426 = vperm.xlu1 %1117, %v1016_v27  }
  0x9a   : > { %439 = vperm.xlu1 %1117, %v1017_v29   ;;  %298 = vrot.lane.b32.xlu0 %v297_v30, %s1184_s10  ;;  %s1190_s10 = smov 8  }
  0x9e   : > { %314 = vrot.lane.b32.xlu1 %v1007_v31, %s1188_s15  ;;  %304 = vrot.lane.b32.xlu0 %v1006_v32, %s1189_s16  ;;  %s1199_s15 = smov 65  }
  0xa1   : > { %v1380_v35 = vpop.permute.xlu1 %361  ;;  %v1388_v38 = vpop.permute.xlu0 %348 }
  0xa2   : > { %340 = vperm.xlu1 %1117, %v337_v33   ;;  %321 = vrot.lane.b32.xlu0 %v1008_v34, %s1190_s10  ;;  %v674_v40 = vmul.f32 %v1388_v38, %v1296_v6  ;;  %v680_v45 = vmul.f32 %v1380_v35, %v1288_v4  ;;  %s999_s10 = sshll.u32 %s215_s25, 3 }
  0xa3   : > { %s217_s30 = scalar_lea.vmem [#allocation2], %s999_s10 }
  0xa5   : > { %v270_v39 = vpop.permute.xlu1 %269  ;;  %v1393_v41 = vpop.permute.xlu0 %374 }
  0xa6   : > { %450 = vperm.xlu1 %1117, %v335_v36   ;;  %256 = vrot.lane.b32.xlu0 %v1002_v37, %s1191_s6  ;;  %v554_v44 = vmul.f32 %v1393_v41, %v1296_v6 }
  0xa9   : > { %v1395_v42 = vpop.permute.xlu1 %387  ;;  %v279_v49 = vpop.permute.xlu0 %278 }
  0xaa   : > { %v390_v43 = vmul.f32 %v1395_v42, %v1296_v6  ;;  %676 = vrot.lane.b32.xlu1 %v674_v40, %s1187_s9  ;;  %v560_v48 = vmul.f32 %v1395_v42, %v1288_v4  ;;  %v688_v50 = vmul.f32 %v1395_v42, %v1286_v3 }
  0xac   : > { %392 = vrot.lane.b32.xlu0 %v390_v43, %s1191_s6 }
  0xad   : > { %v1405_v46 = vpop.permute.xlu1 %400  ;;  %v1417_v51 = vpop.permute.xlu0 %413 }
  0xae   : > { %556 = vrot.lane.b32.xlu1 %v554_v44, %s1185_s17  ;;  %v403_v47 = vmul.f32 %v1405_v46, %v1288_v4  ;;  %v572_v52 = vmul.f32 %v1417_v51, %v1286_v3  ;;  %v694_v8 = vmul.f32 %v1405_v46, %v1294_v5 }
  0xb0   : > { %682 = vrot.lane.b32.xlu0 %v680_v45, %s1187_s9 }
  0xb2   : > { %405 = vrot.lane.b32.xlu1 %v403_v47, %s1191_s6  ;;  %v1009_v47 = vsel %vm326_vm8, 1.0, %v1183_v1 }
  0xb4   : > { %562 = vrot.lane.b32.xlu0 %v560_v48, %s1185_s17 }
  0xb8   : > { %690 = vrot.lane.b32.xlu0 %v688_v50, %s1187_s9 }
  0xbc   : > { %574 = vrot.lane.b32.xlu0 %v572_v52, %s1185_s17 }
 0x100   : > { %v264_v54 = vpop.permute.xlu1 %263 }
 0x101   : > { %v265_v63 = vsel %vm245_vm5, %v264_v54, %v1286_v3 }
 0x102   : > { %v272_v9 = vmul.f32 %v270_v39, %v265_v63  ;;  %v281_v10 = vmul.f32 %v279_v49, %v265_v63 }
 0x104   : > { %v250_v53 = vpop.permute.xlu0 %249  ;;  %v292_v56 = vpop.permute.xlu1 %291  ;;  %v548_v19 = vmul.f32 %v1380_v35, %v281_v10  ;;  %v351_v20 = vmul.f32 %v1388_v38, %v272_v9 }
 0x105   : > { %v1429_v60 = vsel %vm245_vm5, %v250_v53, %v1294_v5 }
 0x106   : > { %v273_v0 = vmul.f32 %v270_v39, %v1429_v60  ;;  %v308_v21 = vmul.f32 %v292_v56, %v1429_v60 }
 0x108   : > { %v286_v55 = vpop.permute.xlu0 %285  ;;  %v364_v14 = vmul.f32 %v1380_v35, %v273_v0  ;;  %v546_v23 = vmul.f32 %v1388_v38, %v273_v0  ;;  %v416_v29 = vmul.f32 %v1417_v51, %v308_v21  ;;  %v686_v43 = vmul.f32 %v1393_v41, %v308_v21 }
 0x109   : > { %v287_v16 = vsel %vm245_vm5, %v286_v55, %v1288_v4 }
 0x10a   : > { %v294_v22 = vmul.f32 %v292_v56, %v287_v16 }
 0x10c   : > { %v299_v57 = vpop.permute.xlu0 %298  ;;  %v377_v32 = vmul.f32 %v1393_v41, %v294_v22 }
 0x10d   : > { %v1461_v25 = vsel %vm245_vm5, %v299_v57, %v1296_v6 }
 0x110   : > { %v305_v61 = vpop.permute.xlu0 %304 }
 0x111   : > { %v307_v30 = vmul.f32 %v305_v61, %v1461_v25  ;;  %v309_v44 = vmul.f32 %v305_v61, %v265_v63 }
 0x113   : > { %v566_v36 = vmul.f32 %v1405_v46, %v307_v30  ;;  %v804_v53 = vmul.f32 %v1380_v35, %v307_v30  ;;  %v814_v54 = vmul.f32 %v1405_v46, %v309_v44 }
 0x114   : > { %v322_v12 = vpop.permute.xlu0 %321 }
 0x115   : > { %v1423_v58 = vpop.permute.xlu1 %426  ;;  %v324_v48 = vmul.f32 %v322_v12, %v1461_v25  ;;  %v325_v11 = vmul.f32 %v322_v12, %v287_v16 }
 0x116   : > { %v429_v59 = vmul.f32 %v1423_v58, %v1286_v3  ;;  %v578_v15 = vmul.f32 %v1423_v58, %v1294_v5 }
 0x117   : > { %v706_v52 = vmul.f32 %v1423_v58, %v324_v48  ;;  %v820_v55 = vmul.f32 %v1417_v51, %v324_v48  ;;  %v826_v56 = vmul.f32 %v1423_v58, %v325_v11  ;;  %v802_v48 = vmul.f32 %v1388_v38, %v1288_v4 }
 0x118   : > { %431 = vrot.lane.b32.xlu1 %v429_v59, %s1191_s6  ;;  %v1450_v17 = vpop.permute.xlu0 %256  ;;  %v810_v4 = vmul.f32 %v1393_v41, %v1286_v3 }
 0x119   : > { %v1432_v62 = vpop.permute.xlu1 %439  ;;  %v259_v10 = vmul.f32 %v1450_v17, %v1429_v60 }
 0x11a   : > { %v442_v2 = vmul.f32 %v1432_v62, %v1294_v5  ;;  %v584_v50 = vmul.f32 %v1432_v62, %v309_v44  ;;  %v712_v7 = vmul.f32 %v1432_v62, %v325_v11 }
 0x11c   : > { %444 = vrot.lane.b32.xlu0 %v442_v2, %s1191_s6  ;;  %696 = vrot.lane.b32.xlu1 %v694_v8, %s1187_s9  ;;  %s1194_s9 = smov 9  }
 0x11d   : > { %v315_v13 = vpop.permute.xlu1 %314 }
 0x11e   : > { %v393_v27 = vpop.permute.xlu0 %392  ;;  %v317_v31 = vmul.f32 %v315_v13, %v287_v16 }
 0x120   : > { %366 = vrot.lane.b32.xlu0 %v364_v14, %s1192_s7  ;;  %580 = vrot.lane.b32.xlu1 %v578_v15, %s1185_s17  ;;  %v700_v37 = vmul.f32 %v1417_v51, %v317_v31 }
 0x121   : > { %v1452_v18 = vpop.permute.xlu1 %340 }
 0x122   : > { %v545_v24 = vmul.f32 %v1452_v18, %v272_v9  ;;  %v673_v33 = vmul.f32 %v1452_v18, %v294_v22  ;;  %v683_v40 = vpop.permute.xlu0 %682  ;;  %v343_v51 = vmul.f32 %v1452_v18, %v259_v10  ;;  %v334_v10 = vld [vmem:[%s1593_s3] sm:$0xff] }
 0x124   : > { %550 = vrot.lane.b32.xlu0 %v548_v19, %s1192_s7  ;;  %353 = vrot.lane.b32.xlu1 %v351_v20, %s1192_s7  ;;  %v547_v26 = vadd.f32 %v546_v23, %v545_v24 }
 0x125   : > { %v1465_v28 = vpop.permute.xlu1 %450 }
 0x126   : > { %v563_v57 = vpop.permute.xlu0 %562 }
 0x128   : > { %418 = vrot.lane.b32.xlu0 %v416_v29, %s1193_s8  ;;  %379 = vrot.lane.b32.xlu1 %v377_v32, %s1193_s8 }
 0x129   : > { %v677_v34 = vpop.permute.xlu1 %676 }
 0x12a   : > { %v679_v39 = vadd.f32 %v677_v34, %v673_v33  ;;  %v691_v61 = vpop.permute.xlu0 %690 }
 0x12c   : > { %v685_v45 = vadd.f32 %v683_v40, %v679_v39  ;;  %702 = vrot.lane.b32.xlu0 %v700_v37, %s1185_s17  ;;  %568 = vrot.lane.b32.xlu1 %v566_v36, %s1191_s6  ;;  %v801_v39 = vmul.f32 %v1452_v18, %v1296_v6  ;;  %s1196_s17 = smov 119  }
 0x12d   : > { %v557_v59 = vpop.permute.xlu1 %556 }
 0x12e   : > { %v687_v49 = vadd.f32 %v686_v43, %v685_v45  ;;  %v575_v0 = vpop.permute.xlu0 %574 }
 0x130   : > { %586 = vrot.lane.b32.xlu0 %v584_v50, %s1191_s6  ;;  %330 = vrot.lane.b32.xlu1 %v1009_v47, %s1194_s9  ;;  %v693_v32 = vadd.f32 %v691_v61, %v687_v49  ;;  %v336_v61 = vld [vmem:[%s1594_s4] sm:$0xff]  ;;  %s1546_s9 = scalar_lea.hbm %s1595_s5, %s1027_s26 }
 0x131   : > { %v406_v63 = vpop.permute.xlu1 %405 }
 0x134   : > { %714 = vrot.lane.b32.xlu0 %v712_v7, %s1191_s6  ;;  %708 = vrot.lane.b32.xlu1 %v706_v52, %s1191_s6  ;;  %v803_v7 = vadd.f32 %v802_v48, %v801_v39  ;;  %s936_s6 = sshll.u32 %s217_s30, 4  ;;  %s1548_s6 = int_to_ptr.vmem [resolvable:$true] %s936_s6 }
 0x138   : > { %816 = vrot.lane.b32.xlu0 %v814_v54, %s1192_s7  ;;  %806 = vrot.lane.b32.xlu1 %v804_v53, %s1192_s7 }
 0x13c   : > { %828 = vrot.lane.b32.xlu0 %v826_v56, %s1193_s8  ;;  %822 = vrot.lane.b32.xlu1 %v820_v55, %s1193_s8  ;;  %v812_v56 = vmul.f32 %v1395_v42, %v1294_v5 }
 0x18a   : > { %v432_v35 = vpop.permute.xlu1 %431 }
 0x18e   : > { %v445_v2 = vpop.permute.xlu0 %444  ;;  %v697_v46 = vpop.permute.xlu1 %696 }
 0x18f   : > { %v699_v34 = vadd.f32 %v697_v46, %v693_v32 }
 0x192   : > { %v367_v8 = vpop.permute.xlu0 %366  ;;  %v581_v9 = vpop.permute.xlu1 %580 }
 0x196   : > { %v551_v58 = vpop.permute.xlu0 %550  ;;  %v354_v12 = vpop.permute.xlu1 %353 }
 0x197   : > { %v553_v13 = vadd.f32 %v551_v58, %v547_v26  ;;  %v356_v14 = vadd.f32 %v354_v12, %v343_v51 }
 0x199   : > { %v559_v15 = vadd.f32 %v557_v59, %v553_v13  ;;  %v369_v16 = vadd.f32 %v367_v8, %v356_v14 }
 0x19a   : > { %v419_v19 = vpop.permute.xlu0 %418  ;;  %v380_v20 = vpop.permute.xlu1 %379 }
 0x19b   : > { %v382_v21 = vadd.f32 %v380_v20, %v369_v16  ;;  %v565_v23 = vadd.f32 %v563_v57, %v559_v15 }
 0x19d   : > { %v395_v22 = vadd.f32 %v393_v27, %v382_v21 }
 0x19e   : > { %v703_v24 = vpop.permute.xlu0 %702  ;;  %v569_v29 = vpop.permute.xlu1 %568 }
 0x19f   : > { %v408_v30 = vadd.f32 %v406_v63, %v395_v22  ;;  %v571_v31 = vadd.f32 %v569_v29, %v565_v23  ;;  %v705_v40 = vadd.f32 %v703_v24, %v699_v34 }
 0x1a1   : > { %v421_v33 = vadd.f32 %v419_v19, %v408_v30  ;;  %v577_v60 = vadd.f32 %v575_v0, %v571_v31 }
 0x1a2   : > { %v587_v17 = vpop.permute.xlu0 %586  ;;  %v331_v26 = vpop.permute.xlu1 %330 }
 0x1a3   : > { %v434_v36 = vadd.f32 %v432_v35, %v421_v33  ;;  %v583_v27 = vadd.f32 %v581_v9, %v577_v60  ;;  %v333_v37 = vmul.f32 %v331_v26, %v1461_v25 }
 0x1a5   : > { %v589_v43 = vadd.f32 %v587_v17, %v583_v27  ;;  %v832_v44 = vmul.f32 %v1432_v62, %v333_v37  ;;  %v447_v45 = vadd.f32 %v445_v2, %v434_v36 }
 0x1a6   : > { %v709_v47 = vpop.permute.xlu1 %708  ;;  %v715_v25 = vpop.permute.xlu0 %714 }
 0x1a7   : > { %v590_v49 = vadd.f32 %v589_v43, %v1465_v28  ;;  %v711_v50 = vadd.f32 %v709_v47, %v705_v40  ;;  %834 = vrot.lane.b32.xlu1 %v832_v44, %s1196_s17  ;;  %v453_v11 = vadd.f32 %v1465_v28, %v447_v45  ;;  %s923_s17 = scalar_lea.sflag [#allocation3], %s215_s25 }
 0x1a9   : > { %v717_v52 = vadd.f32 %v715_v25, %v711_v50  ;;  %vm454_vm10 = vcmp.ge.f32.partialorder %v453_v11, 0.0  ;;  %v455_v6 = vmul.f32 0.2, %v453_v11  ;;  %vm591_vm11 = vcmp.ge.f32.partialorder %v590_v49, 0.0 }
 0x1aa   : > { %v807_v18 = vpop.permute.xlu1 %806  ;;  %v592_v62 = vmul.f32 0.2, %v590_v49  ;;  %v817_v3 = vpop.permute.xlu0 %816 }
 0x1ab   : > { %v718_v53 = vadd.f32 %v717_v52, %v1465_v28  ;;  %v809_v38 = vadd.f32 %v807_v18, %v803_v7  ;;  %v456_v54 = vsel %vm454_vm10, %v453_v11, %v455_v6 }
 0x1ac   : > { %463 = vrot.lane.b32.xlu0 %v456_v54, %s1197_s11  ;;  %v593_v55 = vsel %vm591_vm11, %v590_v49, %v592_v62  ;;  %s1118_s11 = scalar_lea.vmem %s1548_s6, 128 }
 0x1ad   : > { %v811_v57 = vadd.f32 %v810_v4, %v809_v38  ;;  %595 = vrot.lane.b32.xlu1 %v593_v55, %s1198_s12  ;;  %vm719_vm12 = vcmp.ge.f32.partialorder %v718_v53, 0.0  ;;  %v720_v59 = vmul.f32 0.2, %v718_v53  ;;  %p1119_p11 = scmp.ne.s32.totalorder %s1548_s6, %s1118_s11  ;;  %s1122_s12 = sshll.u32 %s1200_s22, 4  ;;  %s1123_s12 = int_to_ptr.vmem [resolvable:$false] %s1122_s12 }
 0x1ae   : > { %v823_v35 = vpop.permute.xlu1 %822  ;;  %v829_v46 = vpop.permute.xlu0 %828  ;;  %s1124_s13 = scalar_lea.vmem %s1123_s12, 256  ;;  %p1125_p0 = scmp.lt.s32.totalorder %s1548_s6, %s1123_s12 }
 0x1af   : > { %v813_v63 = vadd.f32 %v812_v56, %v811_v57  ;;  %v721_v0 = vsel %vm719_vm12, %v718_v53, %v720_v59  ;;  %p1120_p12 = pnand %p1119_p11, %p1269_p5  ;;  %p1126_p1 = scmp.lt.s32.totalorder %s1124_s13, %s1118_s11 }
 0x1b0   : > { %723 = vrot.lane.b32.xlu0 %v721_v0, %s1199_s15 }
 0x1b1   : > { %459 = vperm.xlu1 %1117, %v336_v61   ;;  %v819_v41 = vadd.f32 %v817_v3, %v813_v63  ;;  %p1121_p13 = pneg %p1120_p12  ;;  %p1127_p2 = por %p1126_p1, %p1125_p0 }
 0x1b3   : > { %v825_v2 = vadd.f32 %v823_v35, %v819_v41  ;;  %p1128_p3 = pnand %p1127_p2, %p1121_p13 }
 0x1b5   : > { %v831_v5 = vadd.f32 %v829_v46, %v825_v2 }
 0x219   : > { %v835_v42 = vpop.permute.xlu1 %834 }
 0x21a   : > { %v837_v8 = vadd.f32 %v835_v42, %v831_v5 }
 0x21c   : > { %v838_v9 = vadd.f32 %v837_v8, %v1465_v28 }
 0x21e   : > { %vm839_vm15 = vcmp.ge.f32.partialorder %v838_v9, 0.0  ;;  %v840_v51 = vmul.f32 0.2, %v838_v9  ;;  %v464_v58 = vpop.permute.xlu0 %463 }
 0x21f   : > { %v596_v12 = vpop.permute.xlu1 %595  ;;  %1040 = vmatpush3.msk.msra.mxu0 %vm469_vm13, %v464_v58 }
 0x220   : > { %1045 = vmatpush3.msk.msra.mxu1 %vm469_vm13, %v596_v12  ;;  %1042 = vmatmul.mubr.msk.f32.vlgmr.msra.gmra.mrb[0].mxu0 %vm465_vm14, %v334_v10  ;;  %v841_v13 = vsel %vm839_vm15, %v838_v9, %v840_v51 }
 0x221   : > { %1047 = vmatmul.mubr.msk.f32.vlgmr.msra.gmra.mrb[0].mxu1 %vm465_vm14, %v334_v10  ;;  %1054 = vmatprep.subr.mxu1 %v1183_v1 }
 0x222   : > { %1055 = vmatpush3.msk.msra.mxu1 %vm469_vm13, %v841_v13  ;;  %1049 = vmatprep.subr.mxu0 %v1183_v1  ;;  %v724_v28 = vpop.permute.xlu0 %723 }
 0x223   : > { %1050 = vmatpush3.msk.msra.mxu0 %vm469_vm13, %v724_v28  ;;  %1051 = vmatprep.mubr.msk.f32.mxu0 %vm1195_vm9, %v1183_v1 }
 0x224   : > { %1056 = vmatprep.mubr.msk.f32.mxu1 %vm1195_vm9, %v1183_v1  ;;  %1052 = vmatmul.mubr.msk.f32.vlgmr.msra.gmra.mrb[2].mxu0 %vm465_vm14, %v334_v10 }
 0x225   : > { %1057 = vmatmul.mubr.msk.f32.vlgmr.msra.gmra.mrb[2].mxu1 %vm465_vm14, %v334_v10 }
 0x230   : > { %v460_v14 = vpop.permute.xlu1 %459 }
 0x2f3   : > { %v538_v15 = vpop.f32.mrb[0].mxu0 }
 0x2f4   : > { %v539_v16 = vadd.f32 %v538_v15, %v460_v14  ;;  %v665_v19 = vpop.f32.mrb[0].mxu1  ;;  %v1043_v20 = vpop.f32.mrb[1].mxu0 }
 0x2f5   : > { %v666_v21 = vadd.f32 %v665_v19, %v460_v14  ;;  %v1048_v22 = vpop.f32.mrb[1].mxu1 }
 0x2f6   : > { %vm542_vm0 = vcmp.ge.f32.partialorder %v539_v16, 0.0  ;;  %v543_v23 = vmul.f32 0.2, %v539_v16 }
 0x2f7   : > { %vm669_vm1 = vcmp.ge.f32.partialorder %v666_v21, 0.0  ;;  %v670_v24 = vmul.f32 0.2, %v666_v21  ;;  %v793_v29 = vpop.f32.mrb[2].mxu0 }
 0x2f8   : > { %v544_v30 = vsel %vm542_vm0, %v539_v16, %v543_v23  ;;  %v794_v1 = vadd.f32 %v793_v29, %v460_v14  ;;  %v911_v31 = vpop.f32.mrb[2].mxu1  ;;  %v1053_v32 = vpop.f32.mrb[3].mxu0 }
 0x2f9   : > { %v671_v33 = vsel %vm669_vm1, %v666_v21, %v670_v24  ;;  %v912_v60 = vadd.f32 %v911_v31, %v460_v14  ;;  %v1058_v17 = vpop.f32.mrb[3].mxu1 }
 0x2fa   : > { %v672_v26 = vadd.f32 %v671_v33, %v544_v30  ;;  %vm797_vm2 = vcmp.ge.f32.partialorder %v794_v1, 0.0  ;;  %v798_v34 = vmul.f32 0.2, %v794_v1 }
 0x2fb   : > { %vm915_vm3 = vcmp.ge.f32.partialorder %v912_v60, 0.0  ;;  %v916_v36 = vmul.f32 0.2, %v912_v60 }
 0x2fc   : > { %v799_v27 = vsel %vm797_vm2, %v794_v1, %v798_v34 }
 0x2fd   : > { %v800_v37 = vadd.f32 %v799_v27, %v672_v26  ;;  %v917_v39 = vsel %vm915_vm3, %v912_v60, %v916_v36 }
 0x2ff   : > { %v918_v40 = vadd.f32 %v917_v39, %v800_v37 }
 0x301   : > { %v919_v43 = vmul.f32 0.25, %v918_v40 }
 0x303   : > { %921 = vst.msk [vmem:[%s217_s30] sm:$0xff] %vm920_vm4, %v919_v43 }
 0x304   : > { %1131 = shalt.err (!%p1128_p3)
}
 0x305   : > { %s1132_s14 = scalar_lea.hbm %s1546_s9, 128  ;;  %s1136_s23 = scalar_lea.hbm %s1595_s5, 256 }
 0x306   : > { %p1133_p4 = scmp.ne.s32.totalorder %s1546_s9, %s1132_s14  ;;  %p1137_p9 = scmp.lt.u32.totalorder %s1546_s9, %s1595_s5 }
 0x307   : > { %p1138_p10 = scmp.lt.u32.totalorder %s1136_s23, %s1132_s14  ;;  %p1140_p12 = scmp.lt.u32.totalorder %s1132_s14, %s1546_s9 }
 0x308   : > { %p1134_p7 = pnand %p1133_p4, %p1269_p5 }
 0x309   : > { %p1139_p11 = por %p1138_p10, %p1137_p9 }
 0x30a   : > { %p1135_p8 = pneg %p1134_p7 }
 0x30b   : > { %p1141_p13 = por %p1140_p12, %p1139_p11 }
 0x30d   : > { %p1142_p0 = pnand %p1141_p13, %p1135_p8 }
 0x30f   : > { %1145 = shalt.err (!%p1142_p0)
}
 0x310   : > { %1059 = dma.vmem_to_hbm [thread:$0]  (%p1269_p5), %s1548_s6, 128, %s1546_s9, %s923_s17  }
 0x311 PF: > { %p1065_p1 = scmp.ge.s32.totalorder %s1180_s21, 2  ;;  %s948_s26 = sand.u32 1, %s1168_s18  }
 0x312   : > { %s949_s30 = scalar_lea.sflag [#allocation3], %s948_s26 }
 0x313   : > { %p1062_p2 = pnand %p1065_p1, %p1273_p6 }
 0x315   : > { %1163 = dma.done.wait (!%p1062_p2), %s949_s30, 128  }
 0x316   : > { %1165 = vsyncadd (!%p1062_p2), %s949_s30, 4294967168  ;;  %p15_p3 = scmp.ge.s32.totalorder %s1256_s24, 4   ;;  %s1604_s18 = smov %s1172_s19 }
 0x317   : > { %s1605_s19 = smov %s1176_s20  ;;  %s1606_s20 = smov %s1267_s27 }
 0x318   : > { %s1607_s21 = smov %s1256_s24  ;;  %17 = sbr.rel (!%p15_p3) target bundleno = 3 (0x3), region = 83 }
 0x31f   :  { %954 = vsyncpa [#allocation3], 1 }
 0x320   :  { %956 = vsyncpa [#allocation3 + $0x1], 1 }

</bundles_post_ra>
